<compile_context>
chip_gen: v5e
topology: v5e:2x2
jax: 0.10.0
libtpu: 0.0.40
codegen_flags: <defaults>
</compile_context>

<pallas_src>
import functools

import jax
import jax.numpy as jnp
from jax.experimental import pallas as pl
from jax.experimental.pallas import tpu as pltpu

EPS = 1e-5                      # BatchNorm2d default eps
LANE = 128                      # TPU lane width
MXU_DTYPE = jnp.bfloat16        # matmul operands + HBM intermediates (f32 accum)
VMEM_LIMIT = 32 * 1024 * 1024   # safe headroom on all generations (incl. v7x)


def _round_up(x, m):
    return (x + m - 1) // m * m


def _pick_tile_m(m, k_p, n_p, in_bytes=2, out_bytes=2,
                 budget=6 * 1024 * 1024, cap=2048):
    """Largest row tile whose double-buffered working set fits a VMEM budget."""
    m8 = _round_up(m, 8)
    cands = [t for t in (8, 16, 32, 64, 128, 256, 512, 1024, 2048, 4096)
             if t <= cap]
    if m8 <= cap and m8 not in cands:
        cands.append(m8)

    def fits(t):
        need = (2 * t * k_p * in_bytes      # A blocks (double buffered)
                + 2 * t * n_p * out_bytes   # out blocks (double buffered)
                + 2 * k_p * n_p * in_bytes  # weight block
                + 4 * t * n_p * 4)          # f32 in-kernel temporaries
        return need <= budget

    ok = [t for t in cands if fits(t)] or [8]
    # Prefer the tile that minimizes padded rows; tie-break on fewer grid steps.
    return min(ok, key=lambda t: (_round_up(m, t), -t))


# ----------------------------------------------------------------------------
# Pallas kernels
# ----------------------------------------------------------------------------
def _matmul_bias_kernel(a_ref, w_ref, b_ref, o_ref):
    """o = A @ W + b   (ConvTranspose2d k=2,s=2 as a lane-dense matmul)."""
    o_ref[...] = (
        jnp.dot(a_ref[...], w_ref[...], preferred_element_type=jnp.float32)
        + b_ref[...]
    ).astype(o_ref.dtype)


def _conv_matmul_stats_kernel(a_ref, w_ref, b_ref, y_ref, stat_ref, *,
                              m_total, tile_m, needs_mask):
    """One im2col matmul tile (single jnp.dot) + masked BatchNorm partial sums.

    a_ref:    (tile_m, K_p)   bf16 im2col rows
    w_ref:    (K_p, CO_p)     bf16
    b_ref:    (1, CO_p)       f32
    y_ref:    (tile_m, CO_p)  bf16 pre-BN conv output
    stat_ref: (1, 2, CO_p)    f32 [sum, sum of squares] over the valid rows
    """
    y = (jnp.dot(a_ref[...], w_ref[...], preferred_element_type=jnp.float32)
         + b_ref[...])
    y_ref[...] = y.astype(y_ref.dtype)
    if needs_mask:
        row = (jax.lax.broadcasted_iota(jnp.int32, (tile_m, 1), 0)
               + pl.program_id(0) * tile_m)
        y = jnp.where(row < m_total, y, 0.0)
    sums = jnp.sum(y, axis=0, keepdims=True)
    sumsq = jnp.sum(y * y, axis=0, keepdims=True)
    stat_ref[0] = jnp.concatenate([sums, sumsq], axis=0)


def _bn_relu_kernel(y_ref, scale_ref, shift_ref, o_ref):
    """o = max(y * scale + shift, 0) with per-channel scale/shift."""
    y = y_ref[...].astype(jnp.float32)
    o_ref[...] = jnp.maximum(y * scale_ref[...] + shift_ref[...],
                             0.0).astype(o_ref.dtype)


# ----------------------------------------------------------------------------
# Wrappers
# ----------------------------------------------------------------------------
def conv_transpose_2x2_s2(x_nhwc, w, b):
    """ConvTranspose2d(kernel=2, stride=2). x_nhwc: (N,H,W,Cin) real channels."""
    n, h, wd, cin = x_nhwc.shape
    cout = w.shape[1]
    m = n * h * wd
    k_p = _round_up(cin, LANE)
    n_cols = 4 * cout
    n_p = _round_up(n_cols, LANE)

    a = jnp.pad(x_nhwc.reshape(m, cin), ((0, 0), (0, k_p - cin))).astype(MXU_DTYPE)

    # (Cin, Cout, 2, 2) -> (K_p, N_p) with columns ordered (dh, dw, co).
    wt = jnp.transpose(w, (0, 2, 3, 1)).reshape(cin, n_cols)
    w_mat = jnp.pad(wt, ((0, k_p - cin), (0, n_p - n_cols))).astype(MXU_DTYPE)
    b_row = jnp.pad(jnp.tile(b, 4), (0, n_p - n_cols)).reshape(1, n_p)
    b_row = b_row.astype(jnp.float32)

    tile_m = _pick_tile_m(m, k_p, n_p)
    m_p = _round_up(m, tile_m)
    if m_p != m:
        a = jnp.pad(a, ((0, m_p - m), (0, 0)))

    out = pl.pallas_call(
        _matmul_bias_kernel,
        out_shape=jax.ShapeDtypeStruct((m_p, n_p), MXU_DTYPE),
        grid_spec=pltpu.PrefetchScalarGridSpec(
            num_scalar_prefetch=0,
            grid=(m_p // tile_m,),
            in_specs=[
                pl.BlockSpec((tile_m, k_p), lambda i: (i, 0)),
                pl.BlockSpec((k_p, n_p), lambda i: (0, 0)),
                pl.BlockSpec((1, n_p), lambda i: (0, 0)),
            ],
            out_specs=pl.BlockSpec((tile_m, n_p), lambda i: (i, 0)),
        ),
        compiler_params=pltpu.CompilerParams(
            dimension_semantics=("parallel",), vmem_limit_bytes=VMEM_LIMIT),
    )(a, w_mat, b_row)

    # Tiny real-channel relayout back to NHWC (2H x 2W) in plain JAX.
    out = out[:m, :n_cols].astype(jnp.float32)
    out = out.reshape(n, h, wd, 2, 2, cout).transpose(0, 1, 3, 2, 4, 5)
    return out.reshape(n, 2 * h, 2 * wd, cout)


def conv3x3_matmul_stats(x_nhwc, w, b, co_p):
    """Conv2d(k=3, padding=1) as one im2col matmul per tile + BN partial sums.

    x_nhwc: (N,H,W,Cin) real channels; w: (CO, Cin, 3, 3); b: (CO,).
    Returns y (M_p, CO_p) MXU_DTYPE (rows >= N*H*W are padding) and
    stats (grid_m, 2, CO_p) f32 (padded rows excluded via in-kernel mask).
    """
    n, h, wd, cin = x_nhwc.shape
    cout = w.shape[0]
    m = n * h * wd
    k = 9 * cin
    k_p = _round_up(k, LANE)
    # TODO(synk): for large Cin a manual halo-DMA formulation avoids the 9x
    # im2col duplication in HBM; at these channel counts K fits one 128 slab.

    # im2col: taps ordered (kh, kw), channels innermost.
    xp = jnp.pad(x_nhwc, ((0, 0), (1, 1), (1, 1), (0, 0)))
    cols = [xp[:, kh:kh + h, kw:kw + wd, :] for kh in range(3) for kw in range(3)]
    a = jnp.concatenate(cols, axis=-1).reshape(m, k)
    a = jnp.pad(a, ((0, 0), (0, k_p - k))).astype(MXU_DTYPE)

    # Weights: (CO, Cin, 3, 3) -> (9*Cin, CO) with rows ordered (kh, kw, cin).
    wm = jnp.transpose(w, (2, 3, 1, 0)).reshape(k, cout)
    w_mat = jnp.pad(wm, ((0, k_p - k), (0, co_p - cout))).astype(MXU_DTYPE)
    b_row = jnp.pad(b, (0, co_p - cout)).reshape(1, co_p).astype(jnp.float32)

    tile_m = _pick_tile_m(m, k_p, co_p)
    m_p = _round_up(m, tile_m)
    if m_p != m:
        a = jnp.pad(a, ((0, m_p - m), (0, 0)))
    grid_m = m_p // tile_m

    kernel = functools.partial(_conv_matmul_stats_kernel, m_total=m,
                               tile_m=tile_m, needs_mask=(m_p != m))
    y, stats = pl.pallas_call(
        kernel,
        out_shape=(
            jax.ShapeDtypeStruct((m_p, co_p), MXU_DTYPE),
            jax.ShapeDtypeStruct((grid_m, 2, co_p), jnp.float32),
        ),
        grid_spec=pltpu.PrefetchScalarGridSpec(
            num_scalar_prefetch=0,
            grid=(grid_m,),
            in_specs=[
                pl.BlockSpec((tile_m, k_p), lambda i: (i, 0)),
                pl.BlockSpec((k_p, co_p), lambda i: (0, 0)),
                pl.BlockSpec((1, co_p), lambda i: (0, 0)),
            ],
            out_specs=(
                pl.BlockSpec((tile_m, co_p), lambda i: (i, 0)),
                pl.BlockSpec((1, 2, co_p), lambda i: (i, 0, 0)),
            ),
        ),
        compiler_params=pltpu.CompilerParams(
            dimension_semantics=("parallel",), vmem_limit_bytes=VMEM_LIMIT),
    )(a, w_mat, b_row)
    return y, stats


def _bn_scale_shift(stats, gamma, beta, count, co_p):
    """Finalize BatchNorm batch statistics (training mode, biased variance)."""
    tot = jnp.sum(stats, axis=0)                    # (2, CO_p)
    mean = tot[0] / count
    var = jnp.maximum(tot[1] / count - mean * mean, 0.0)
    inv = jax.lax.rsqrt(var + EPS)
    g = jnp.pad(gamma, (0, co_p - gamma.shape[0]))
    bt = jnp.pad(beta, (0, co_p - beta.shape[0]))
    scale = (g * inv).astype(jnp.float32)
    shift = (bt - mean * scale).astype(jnp.float32)
    return scale.reshape(1, co_p), shift.reshape(1, co_p)
    # TODO(synk): running_mean/running_var state update (stateful BN) not modeled.


def bn_relu(y, scale, shift, tile_m, out_dtype):
    """Tiled scale/shift + ReLU over the (M_p, CO_p) lane-dense view."""
    m_p, co_p = y.shape
    return pl.pallas_call(
        _bn_relu_kernel,
        out_shape=jax.ShapeDtypeStruct((m_p, co_p), out_dtype),
        grid_spec=pltpu.PrefetchScalarGridSpec(
            num_scalar_prefetch=0,
            grid=(m_p // tile_m,),
            in_specs=[
                pl.BlockSpec((tile_m, co_p), lambda i: (i, 0)),
                pl.BlockSpec((1, co_p), lambda i: (0, 0)),
                pl.BlockSpec((1, co_p), lambda i: (0, 0)),
            ],
            out_specs=pl.BlockSpec((tile_m, co_p), lambda i: (i, 0)),
        ),
        compiler_params=pltpu.CompilerParams(
            dimension_semantics=("parallel",), vmem_limit_bytes=VMEM_LIMIT),
    )(y, scale, shift)


def _interp_matrix(out_sz, in_sz):
    """align_corners=True bilinear interpolation as a dense (out, in) matrix."""
    if out_sz == 1:
        pos = jnp.zeros((1,), jnp.float32)
    else:
        pos = jnp.arange(out_sz, dtype=jnp.float32) * ((in_sz - 1) / (out_sz - 1))
    lo = jnp.floor(pos).astype(jnp.int32)
    hi = jnp.minimum(lo + 1, in_sz - 1)
    frac = pos - lo.astype(jnp.float32)
    cols = jnp.arange(in_sz)[None, :]
    return ((cols == lo[:, None]) * (1.0 - frac[:, None])
            + (cols == hi[:, None]) * frac[:, None]).astype(jnp.float32)


def bilinear_resize_nhwc(x, out_h, out_w):
    """F.interpolate(bilinear, align_corners=True) as two dense matmuls."""
    n, in_h, in_w, c = x.shape
    if in_h == out_h and in_w == out_w:
        return x
    rm = _interp_matrix(out_h, in_h)
    cm = _interp_matrix(out_w, in_w)
    x = jnp.einsum("oh,nhwc->nowc", rm, x)
    return jnp.einsum("pw,nowc->nopc", cm, x)


# ----------------------------------------------------------------------------
# decoder.forward
# ----------------------------------------------------------------------------
@functools.partial(jax.jit, static_argnames=("interpolate",))
def decoder_forward(params, x_copy, x, interpolate=True):
    n, _, h, w = x.shape
    _, cout, hc, wc = x_copy.shape
    co_p = _round_up(cout, LANE)

    x_nhwc = x.transpose(0, 2, 3, 1)
    xc_nhwc = x_copy.transpose(0, 2, 3, 1)

    # 1) ConvTranspose2d(k=2, s=2) as a lane-dense Pallas matmul.
    up = conv_transpose_2x2_s2(x_nhwc, params["up_w"], params["up_b"])

    # 2) Resize to the skip resolution (identity when 2x upsample already matches).
    if interpolate:
        up = bilinear_resize_nhwc(up, hc, wc)
    else:
        # Spec-faithful: F.pad with diffs measured against the PRE-upsample x
        # (exactly mirrors the reference module's diffY/diffX computation).
        dy, dx = hc - h, wc - w
        up = jnp.pad(up, ((0, 0), (dy // 2, dy - dy // 2),
                          (dx // 2, dx - dx // 2), (0, 0)))

    count = n * hc * wc

    # 3) conv1 over the REAL channel concat (padded to one 128-lane K slab once),
    #    one matmul per tile, plus BN1 partial sums.
    xcat = jnp.concatenate([xc_nhwc, up], axis=-1)
    y1, st1 = conv3x3_matmul_stats(xcat, params["c1_w"], params["c1_b"], co_p)
    sc1, sh1 = _bn_scale_shift(st1, params["bn1_g"], params["bn1_b"], count, co_p)

    # 4) BN1 + ReLU fused into conv2's im2col build: only the real channels of
    #    y1 are touched; no full-width normalized intermediate is materialized.
    a1 = jnp.maximum(y1[:count, :cout].astype(jnp.float32) * sc1[:, :cout]
                     + sh1[:, :cout], 0.0)
    a1 = a1.reshape(n, hc, wc, cout)

    # 5) conv2 + BN2 + ReLU (final normalize as one large-tile Pallas pass).
    y2, st2 = conv3x3_matmul_stats(a1, params["c2_w"], params["c2_b"], co_p)
    sc2, sh2 = _bn_scale_shift(st2, params["bn2_g"], params["bn2_b"], count, co_p)
    bn_tile = y2.shape[0] // st2.shape[0]
    out = bn_relu(y2, sc2, sh2, bn_tile, jnp.float32)

    # Strip padding, back to NCHW.
    out = out[:count, :cout].reshape(n, hc, wc, cout)
    return out.transpose(0, 3, 1, 2)


def init_params(key, in_channels, out_channels):
    ks = jax.random.split(key, 6)
    f32 = jnp.float32
    return {
        # ConvTranspose2d(in, out, 2, 2): weight (in, out, 2, 2)
        "up_w": jax.random.normal(ks[0], (in_channels, out_channels, 2, 2), f32) * 0.1,
        "up_b": jax.random.normal(ks[1], (out_channels,), f32) * 0.1,
        # Conv2d(in, out, 3, padding=1)
        "c1_w": jax.random.normal(ks[2], (out_channels, in_channels, 3, 3), f32) * 0.1,
        "c1_b": jax.random.normal(ks[3], (out_channels,), f32) * 0.1,
        "bn1_g": jnp.ones((out_channels,), f32),
        "bn1_b": jnp.zeros((out_channels,), f32),
        # Conv2d(out, out, 3, padding=1)
        "c2_w": jax.random.normal(ks[4], (out_channels, out_channels, 3, 3), f32) * 0.1,
        "c2_b": jax.random.normal(ks[5], (out_channels,), f32) * 0.1,
        "bn2_g": jnp.ones((out_channels,), f32),
        "bn2_b": jnp.zeros((out_channels,), f32),
    }


if __name__ == "__main__":
    in_channels, out_channels = 8, 4
    key = jax.random.PRNGKey(0)
    kp, kc, kx = jax.random.split(key, 3)

    params = init_params(kp, in_channels, out_channels)
    # x_copy: skip connection at the upsampled resolution; x: lower-res feature map.
    x_copy = jax.random.normal(kc, (2, out_channels, 16, 16), jnp.float32)
    x = jax.random.normal(kx, (2, in_channels, 8, 8), jnp.float32)

    out = decoder_forward(params, x_copy, x, interpolate=True)
    out = jax.block_until_ready(out)
    assert out.shape == (2, out_channels, 16, 16), out.shape
    assert bool(jnp.all(jnp.isfinite(out)))
    print("KERNEL_OK")
</pallas_src>

<mosaic_0001>
module attributes {stable_mosaic.version = 11 : i64} {
  func.func @_matmul_bias_kernel(%arg0: i32, %arg1: memref<128x128xbf16, #tpu.memory_space<vmem>>, %arg2: memref<128x128xbf16, #tpu.memory_space<vmem>>, %arg3: memref<1x128xf32, #tpu.memory_space<vmem>>, %arg4: memref<128x128xbf16, #tpu.memory_space<vmem>>) attributes {dimension_semantics = [#tpu.dimension_semantics<parallel>], iteration_bounds = array<i64: 1>, scalar_prefetch = 0 : i64, scratch_operands = 0 : i64, tpu.core_type = #tpu.core_type<tc>, window_params = [{transform_indices = @transform_0, window_bounds = array<i64: 128, 128>}, {pipeline_mode = #tpu.pipeline_mode<synchronous>, transform_indices = @transform_1, window_bounds = array<i64: 128, 128>}, {pipeline_mode = #tpu.pipeline_mode<synchronous>, transform_indices = @transform_2, window_bounds = array<i64: 1, 128>}, {transform_indices = @transform_3, window_bounds = array<i64: 128, 128>}]} {
    %c0 = arith.constant 0 : index
    %c0_0 = arith.constant 0 : index
    %0 = vector.load %arg1[%c0, %c0_0] : memref<128x128xbf16, #tpu.memory_space<vmem>>, vector<128x128xbf16>
    %c0_1 = arith.constant 0 : index
    %c0_2 = arith.constant 0 : index
    %1 = vector.load %arg2[%c0_1, %c0_2] : memref<128x128xbf16, #tpu.memory_space<vmem>>, vector<128x128xbf16>
    %cst = arith.constant dense<0.000000e+00> : vector<128x128xf32>
    %2 = tpu.matmul %0, %1, %cst {dimension_numbers = #tpu.dot_dimension_numbers<[1], [0], [0], [1], [0, 0, 1, 1], [], []>} : vector<128x128xbf16>, vector<128x128xbf16>, vector<128x128xf32> -> vector<128x128xf32>
    %c0_3 = arith.constant 0 : index
    %c0_4 = arith.constant 0 : index
    %3 = vector.load %arg3[%c0_3, %c0_4] : memref<1x128xf32, #tpu.memory_space<vmem>>, vector<1x128xf32>
    %4 = vector.broadcast %3 : vector<1x128xf32> to vector<128x128xf32>
    %5 = arith.addf %2, %4 : vector<128x128xf32>
    %6 = arith.truncf %5 : vector<128x128xf32> to vector<128x128xbf16>
    %c0_5 = arith.constant 0 : index
    %c0_6 = arith.constant 0 : index
    %7 = vector.load %arg4[%c0_5, %c0_6] : memref<128x128xbf16, #tpu.memory_space<vmem>>, vector<128x128xbf16>
    tpu.vector_store %arg4[%c0_5, %c0_6], %6 {strides = array<i32>} : memref<128x128xbf16, #tpu.memory_space<vmem>>, vector<128x128xbf16>,
    return
  }
  func.func @transform_0(%arg0: i32) -> (i32, i32) {
    %c0_i32 = arith.constant 0 : i32
    %c0_i32_0 = arith.constant 0 : i32
    return %arg0, %c0_i32 : i32, i32
  }
  func.func @transform_1(%arg0: i32) -> (i32, i32) {
    %c0_i32 = arith.constant 0 : i32
    %c0_i32_0 = arith.constant 0 : i32
    %c0_i32_1 = arith.constant 0 : i32
    return %c0_i32, %c0_i32_0 : i32, i32
  }
  func.func @transform_2(%arg0: i32) -> (i32, i32) {
    %c0_i32 = arith.constant 0 : i32
    %c0_i32_0 = arith.constant 0 : i32
    %c0_i32_1 = arith.constant 0 : i32
    return %c0_i32, %c0_i32_0 : i32, i32
  }
  func.func @transform_3(%arg0: i32) -> (i32, i32) {
    %c0_i32 = arith.constant 0 : i32
    %c0_i32_0 = arith.constant 0 : i32
    return %arg0, %c0_i32 : i32, i32
  }
}

module attributes {stable_mosaic.version = 11 : i64} {
  func.func @_conv_matmul_stats_kernel(%arg0: i32, %arg1: memref<512x128xbf16, #tpu.memory_space<vmem>>, %arg2: memref<128x128xbf16, #tpu.memory_space<vmem>>, %arg3: memref<1x128xf32, #tpu.memory_space<vmem>>, %arg4: memref<512x128xbf16, #tpu.memory_space<vmem>>, %arg5: memref<1x2x128xf32, #tpu.memory_space<vmem>>) attributes {dimension_semantics = [#tpu.dimension_semantics<parallel>], iteration_bounds = array<i64: 1>, scalar_prefetch = 0 : i64, scratch_operands = 0 : i64, tpu.core_type = #tpu.core_type<tc>, window_params = [{transform_indices = @transform_0, window_bounds = array<i64: 512, 128>}, {pipeline_mode = #tpu.pipeline_mode<synchronous>, transform_indices = @transform_1, window_bounds = array<i64: 128, 128>}, {pipeline_mode = #tpu.pipeline_mode<synchronous>, transform_indices = @transform_2, window_bounds = array<i64: 1, 128>}, {transform_indices = @transform_3, window_bounds = array<i64: 512, 128>}, {transform_indices = @transform_4, window_bounds = array<i64: 1, 2, 128>}]} {
    %c0 = arith.constant 0 : index
    %c0_0 = arith.constant 0 : index
    %0 = vector.load %arg1[%c0, %c0_0] : memref<512x128xbf16, #tpu.memory_space<vmem>>, vector<512x128xbf16>
    %c0_1 = arith.constant 0 : index
    %c0_2 = arith.constant 0 : index
    %1 = vector.load %arg2[%c0_1, %c0_2] : memref<128x128xbf16, #tpu.memory_space<vmem>>, vector<128x128xbf16>
    %cst = arith.constant dense<0.000000e+00> : vector<512x128xf32>
    %2 = tpu.matmul %0, %1, %cst {dimension_numbers = #tpu.dot_dimension_numbers<[1], [0], [0], [1], [0, 0, 1, 1], [], []>} : vector<512x128xbf16>, vector<128x128xbf16>, vector<512x128xf32> -> vector<512x128xf32>
    %c0_3 = arith.constant 0 : index
    %c0_4 = arith.constant 0 : index
    %3 = vector.load %arg3[%c0_3, %c0_4] : memref<1x128xf32, #tpu.memory_space<vmem>>, vector<1x128xf32>
    %4 = vector.broadcast %3 : vector<1x128xf32> to vector<512x128xf32>
    %5 = arith.addf %2, %4 : vector<512x128xf32>
    %6 = arith.truncf %5 : vector<512x128xf32> to vector<512x128xbf16>
    %c0_5 = arith.constant 0 : index
    %c0_6 = arith.constant 0 : index
    %7 = vector.load %arg4[%c0_5, %c0_6] : memref<512x128xbf16, #tpu.memory_space<vmem>>, vector<512x128xbf16>
    tpu.vector_store %arg4[%c0_5, %c0_6], %6 {strides = array<i32>} : memref<512x128xbf16, #tpu.memory_space<vmem>>, vector<512x128xbf16>,
    %cst_7 = arith.constant dense<0.000000e+00> : vector<128xf32>
    %8 = vector.multi_reduction <add>, %5, %cst_7 [0] : vector<512x128xf32> to vector<128xf32>
    %9 = vector.shape_cast %8 : vector<128xf32> to vector<1x128xf32>
    %10 = arith.mulf %5, %5 : vector<512x128xf32>
    %cst_8 = arith.constant dense<0.000000e+00> : vector<128xf32>
    %11 = vector.multi_reduction <add>, %10, %cst_8 [0] : vector<512x128xf32> to vector<128xf32>
    %12 = vector.shape_cast %11 : vector<128xf32> to vector<1x128xf32>
    %13 = tpu.concatenate %9, %12 in 0 : vector<1x128xf32>, vector<1x128xf32> -> vector<2x128xf32>
    %c0_9 = arith.constant 0 : index
    %c0_10 = arith.constant 0 : index
    %c0_11 = arith.constant 0 : index
    %14 = vector.load %arg5[%c0_9, %c0_10, %c0_11] : memref<1x2x128xf32, #tpu.memory_space<vmem>>, vector<1x2x128xf32>
    %15 = vector.shape_cast %14 : vector<1x2x128xf32> to vector<2x128xf32>
    %16 = vector.shape_cast %13 : vector<2x128xf32> to vector<1x2x128xf32>
    tpu.vector_store %arg5[%c0_9, %c0_10, %c0_11], %16 {strides = array<i32>} : memref<1x2x128xf32, #tpu.memory_space<vmem>>, vector<1x2x128xf32>,
    return
  }
  func.func @transform_0(%arg0: i32) -> (i32, i32) {
    %c0_i32 = arith.constant 0 : i32
    %c0_i32_0 = arith.constant 0 : i32
    return %arg0, %c0_i32 : i32, i32
  }
  func.func @transform_1(%arg0: i32) -> (i32, i32) {
    %c0_i32 = arith.constant 0 : i32
    %c0_i32_0 = arith.constant 0 : i32
    %c0_i32_1 = arith.constant 0 : i32
    return %c0_i32, %c0_i32_0 : i32, i32
  }
  func.func @transform_2(%arg0: i32) -> (i32, i32) {
    %c0_i32 = arith.constant 0 : i32
    %c0_i32_0 = arith.constant 0 : i32
    %c0_i32_1 = arith.constant 0 : i32
    return %c0_i32, %c0_i32_0 : i32, i32
  }
  func.func @transform_3(%arg0: i32) -> (i32, i32) {
    %c0_i32 = arith.constant 0 : i32
    %c0_i32_0 = arith.constant 0 : i32
    return %arg0, %c0_i32 : i32, i32
  }
  func.func @transform_4(%arg0: i32) -> (i32, i32, i32) {
    %c0_i32 = arith.constant 0 : i32
    %c0_i32_0 = arith.constant 0 : i32
    %c0_i32_1 = arith.constant 0 : i32
    return %arg0, %c0_i32, %c0_i32_0 : i32, i32, i32
  }
}

module attributes {stable_mosaic.version = 11 : i64} {
  func.func @_bn_relu_kernel(%arg0: i32, %arg1: memref<512x128xbf16, #tpu.memory_space<vmem>>, %arg2: memref<1x128xf32, #tpu.memory_space<vmem>>, %arg3: memref<1x128xf32, #tpu.memory_space<vmem>>, %arg4: memref<512x128xf32, #tpu.memory_space<vmem>>) attributes {dimension_semantics = [#tpu.dimension_semantics<parallel>], iteration_bounds = array<i64: 1>, scalar_prefetch = 0 : i64, scratch_operands = 0 : i64, tpu.core_type = #tpu.core_type<tc>, window_params = [{transform_indices = @transform_0, window_bounds = array<i64: 512, 128>}, {pipeline_mode = #tpu.pipeline_mode<synchronous>, transform_indices = @transform_1, window_bounds = array<i64: 1, 128>}, {pipeline_mode = #tpu.pipeline_mode<synchronous>, transform_indices = @transform_2, window_bounds = array<i64: 1, 128>}, {transform_indices = @transform_3, window_bounds = array<i64: 512, 128>}]} {
    %c0 = arith.constant 0 : index
    %c0_0 = arith.constant 0 : index
    %0 = vector.load %arg1[%c0, %c0_0] : memref<512x128xbf16, #tpu.memory_space<vmem>>, vector<512x128xbf16>
    %1 = arith.extf %0 : vector<512x128xbf16> to vector<512x128xf32>
    %c0_1 = arith.constant 0 : index
    %c0_2 = arith.constant 0 : index
    %2 = vector.load %arg2[%c0_1, %c0_2] : memref<1x128xf32, #tpu.memory_space<vmem>>, vector<1x128xf32>
    %3 = vector.broadcast %2 : vector<1x128xf32> to vector<512x128xf32>
    %4 = arith.mulf %1, %3 : vector<512x128xf32>
    %c0_3 = arith.constant 0 : index
    %c0_4 = arith.constant 0 : index
    %5 = vector.load %arg3[%c0_3, %c0_4] : memref<1x128xf32, #tpu.memory_space<vmem>>, vector<1x128xf32>
    %6 = vector.broadcast %5 : vector<1x128xf32> to vector<512x128xf32>
    %7 = arith.addf %4, %6 : vector<512x128xf32>
    %cst = arith.constant 0.000000e+00 : f32
    %8 = vector.broadcast %cst : f32 to vector<512x128xf32>
    %9 = arith.maximumf %7, %8 : vector<512x128xf32>
    %c0_5 = arith.constant 0 : index
    %c0_6 = arith.constant 0 : index
    %10 = vector.load %arg4[%c0_5, %c0_6] : memref<512x128xf32, #tpu.memory_space<vmem>>, vector<512x128xf32>
    tpu.vector_store %arg4[%c0_5, %c0_6], %9 {strides = array<i32>} : memref<512x128xf32, #tpu.memory_space<vmem>>, vector<512x128xf32>,
    return
  }
  func.func @transform_0(%arg0: i32) -> (i32, i32) {
    %c0_i32 = arith.constant 0 : i32
    %c0_i32_0 = arith.constant 0 : i32
    return %arg0, %c0_i32 : i32, i32
  }
  func.func @transform_1(%arg0: i32) -> (i32, i32) {
    %c0_i32 = arith.constant 0 : i32
    %c0_i32_0 = arith.constant 0 : i32
    %c0_i32_1 = arith.constant 0 : i32
    return %c0_i32, %c0_i32_0 : i32, i32
  }
  func.func @transform_2(%arg0: i32) -> (i32, i32) {
    %c0_i32 = arith.constant 0 : i32
    %c0_i32_0 = arith.constant 0 : i32
    %c0_i32_1 = arith.constant 0 : i32
    return %c0_i32, %c0_i32_0 : i32, i32
  }
  func.func @transform_3(%arg0: i32) -> (i32, i32) {
    %c0_i32 = arith.constant 0 : i32
    %c0_i32_0 = arith.constant 0 : i32
    return %arg0, %c0_i32 : i32, i32
  }
}

</mosaic_0001>

<bundles_post_ra>
// kernel: tile.8
= control target key start
LH: loop header
LB: loop body
LE: loop exit
PB: predicated region body
PF: predicated region fallthrough
CT: control target
= control target key end

     0   :  { %s22_s0 = inlined_call_operand.vmem [shape: f32[4], index: 0, kind: input, shape index: {}]   ;;  %s23_s1 = inlined_call_operand.vmem [shape: f32[4,4], index: 1, kind: output, shape index: {}]  }
   0x1   :  { %v4_v0 = vld [vmem:[%s22_s0] ss:$0 sm:$0xff] }
   0x2   :  { %5 = vst [vmem:[%s23_s1] sm:$0xf] %v4_v0 }

// kernel: tile.9
= control target key start
LH: loop header
LB: loop body
LE: loop exit
PB: predicated region body
PF: predicated region fallthrough
CT: control target
= control target key end

     0   :  { %s37_s8 = smov 4   ;;  %s38_s9 = smov 8   ;;  %vm7_vm0 = vcmask 31744   ;;  %vm13_vm1 = vcmask 130144   ;;  %vm19_vm2 = vcmask 97344   ;;  %vm25_vm3 = vcmask 64544   ;;  %s55_s0 = inlined_call_operand.vmem [shape: f32[4,4], index: 0, kind: input, shape index: {}]   ;;  %s56_s1 = inlined_call_operand.vmem [shape: f32[16], index: 1, kind: output, shape index: {}]  }
   0x1   :  { %v4_v0 = vld [vmem:[%s55_s0] sm:$0xf]  ;;  %s36_s0 = smov 12  }
   0x2   :  { %5 = vst [vmem:[#allocation1] sm:$0xf] %v4_v0 }
   0x9   :  { %v10_v1 = vld [vmem:[#allocation1 + $0x3] sm:$0x1]   ;;  %v22_v2 = vld [vmem:[#allocation1 + $0x1] sm:$0x1]   ;;  %v16_v3 = vld [vmem:[#allocation1 + $0x2] sm:$0x1]  }
   0xa   :  { %11 = vrot.lane.b32.xlu0 %v10_v1, %s36_s0  ;;  %23 = vrot.lane.b32.xlu1 %v22_v2, %s37_s8  ;;  %v6_v4 = vld [vmem:[#allocation1] sm:$0x1]  }
   0xb   :  { %8 = vst.msk [vmem:[#allocation0] sm:$0x1] %vm7_vm0, %v6_v4  }
  0x12   :  { %17 = vrot.lane.b32.xlu0 %v16_v3, %s38_s9 }
  0x7c   :  { %v12_v5 = vpop.permute.xlu0 %11   ;;  %v24_v6 = vpop.permute.xlu1 %23  }
  0x7d   :  { %14 = vst.msk [vmem:[#allocation0] sm:$0x1] %vm13_vm1, %v12_v5  }
  0x84   :  { %v18_v7 = vpop.permute.xlu0 %17  }
  0x85   :  { %20 = vst.msk [vmem:[#allocation0] sm:$0x1] %vm19_vm2, %v18_v7  }
  0x86   :  { %26 = vst.msk [vmem:[#allocation0] sm:$0x1] %vm25_vm3, %v24_v6  }
  0x8d   :  { %v29_v8 = vld [vmem:[#allocation0] sm:$0x1] }
  0x8e   :  { %32 = vst [vmem:[%s56_s1] sm:$0x1] %v29_v8 }

// kernel: decoder_forward.4
= control target key start
LH: loop header
LB: loop body
LE: loop exit
PB: predicated region body
PF: predicated region fallthrough
CT: control target
= control target key end

     0   :  { %s478_s1 = inlined_call_operand.vmem [shape: bf16[128,128], index: 1, kind: input, shape index: {}]   ;;  %s479_s2 = inlined_call_operand.vmem [shape: f32[1,128], index: 2, kind: input, shape index: {}]   ;;  %s480_s0 = inlined_call_operand.vmem [shape: bf16[128,128], index: 0, kind: input, shape index: {}]   ;;  %s481_s3 = inlined_call_operand.vmem [shape: bf16[128,128], index: 3, kind: output, shape index: {}]  }
   0x1   :  { %v310_v0 = vld [vmem:[%s478_s1 + $0x38] sm:$0xff]  ;;  %v309_v1 = vld [vmem:[%s478_s1 + $0x30] sm:$0xff]  ;;  %v308_v2 = vld [vmem:[%s478_s1 + $0x28] sm:$0xff] }
   0x2   :  { %146 = vmatpush.bf16.msra.mxu0 %v310_v0  ;;  %358 = vmatpush.bf16.msra.mxu1 %v310_v0  ;;  %v307_v3 = vld [vmem:[%s478_s1 + $0x20] sm:$0xff]  ;;  %v306_v4 = vld [vmem:[%s478_s1 + $0x18] sm:$0xff]  ;;  %v305_v5 = vld [vmem:[%s478_s1 + $0x10] sm:$0xff] }
   0x3   :  { %359 = vmatpush.bf16.msra.mxu2 %v310_v0  ;;  %360 = vmatpush.bf16.msra.mxu3 %v310_v0  ;;  %v304_v6 = vld [vmem:[%s478_s1 + $0x8] sm:$0xff]  ;;  %v303_v7 = vld [vmem:[%s478_s1] sm:$0xff]  ;;  %v297_v9 = vld [vmem:[%s480_s0 + $0x10] sm:$0xff] }
   0x4   :  { %v295_v8 = vld [vmem:[%s480_s0] sm:$0xff]  ;;  %v301_v11 = vld [vmem:[%s480_s0 + $0x30] sm:$0xff]  ;;  %v296_v12 = vld [vmem:[%s480_s0 + $0x8] sm:$0xff] }
   0x5   :  { %v299_v10 = vld [vmem:[%s480_s0 + $0x20] sm:$0xff]  ;;  %v298_v13 = vld [vmem:[%s480_s0 + $0x18] sm:$0xff]  ;;  %v300_v14 = vld [vmem:[%s480_s0 + $0x28] sm:$0xff] }
   0x6   :  { %147 = vmatpush.bf16.msra.mxu0 %v309_v1  ;;  %361 = vmatpush.bf16.msra.mxu1 %v309_v1  ;;  %v302_v15 = vld [vmem:[%s480_s0 + $0x38] sm:$0xff]  ;;  %v382_v18 = vld [vmem:[%s479_s2] ss:$0 sm:$0xff] }
   0x7   :  { %362 = vmatpush.bf16.msra.mxu2 %v309_v1  ;;  %363 = vmatpush.bf16.msra.mxu3 %v309_v1 }
   0xa   :  { %148 = vmatpush.bf16.msra.mxu0 %v308_v2  ;;  %364 = vmatpush.bf16.msra.mxu1 %v308_v2 }
   0xb   :  { %365 = vmatpush.bf16.msra.mxu2 %v308_v2  ;;  %366 = vmatpush.bf16.msra.mxu3 %v308_v2 }
   0xe   :  { %149 = vmatpush.bf16.msra.mxu0 %v307_v3  ;;  %367 = vmatpush.bf16.msra.mxu1 %v307_v3 }
   0xf   :  { %368 = vmatpush.bf16.msra.mxu2 %v307_v3  ;;  %369 = vmatpush.bf16.msra.mxu3 %v307_v3 }
  0x12   :  { %150 = vmatpush.bf16.msra.mxu0 %v306_v4  ;;  %370 = vmatpush.bf16.msra.mxu1 %v306_v4 }
  0x13   :  { %371 = vmatpush.bf16.msra.mxu2 %v306_v4  ;;  %372 = vmatpush.bf16.msra.mxu3 %v306_v4 }
  0x16   :  { %151 = vmatpush.bf16.msra.mxu0 %v305_v5  ;;  %373 = vmatpush.bf16.msra.mxu1 %v305_v5 }
  0x17   :  { %374 = vmatpush.bf16.msra.mxu2 %v305_v5  ;;  %375 = vmatpush.bf16.msra.mxu3 %v305_v5 }
  0x1a   :  { %152 = vmatpush.bf16.msra.mxu0 %v304_v6  ;;  %376 = vmatpush.bf16.msra.mxu1 %v304_v6 }
  0x1b   :  { %377 = vmatpush.bf16.msra.mxu2 %v304_v6  ;;  %378 = vmatpush.bf16.msra.mxu3 %v304_v6 }
  0x1e   :  { %153 = vmatpush.bf16.msra.mxu0 %v303_v7  ;;  %379 = vmatpush.bf16.msra.mxu1 %v303_v7 }
  0x1f   :  { %380 = vmatpush.bf16.msra.mxu2 %v303_v7  ;;  %381 = vmatpush.bf16.msra.mxu3 %v303_v7 }
  0x21   :  { %154 = vmatmul.bf16.vlgmr.msra.gmra.mxu0 %v295_v8  ;;  %164 = vmatmul.bf16.vlgmr.msra.gmra.mxu1 %v297_v9 }
  0x22   :  { %174 = vmatmul.bf16.vlgmr.msra.gmra.mxu2 %v299_v10  ;;  %184 = vmatmul.bf16.vlgmr.msra.gmra.mxu3 %v301_v11 }
  0x31   :  { %159 = vmatmul.bf16.gmra.mxu0 %v296_v12  ;;  %169 = vmatmul.bf16.gmra.mxu1 %v298_v13 }
  0x32   :  { %179 = vmatmul.bf16.gmra.mxu2 %v300_v14  ;;  %189 = vmatmul.bf16.gmra.mxu3 %v302_v15 }
  0x9e   :  { %v155_v16 = vpop.f32.mrf.mxu0  ;;  %v165_v17 = vpop.f32.mrf.mxu1 }
  0x9f   :  { %v156_v23 = vadd.f32 %v382_v18, %v155_v16  ;;  %v166_v24 = vadd.f32 %v382_v18, %v165_v17 }
  0xa5   :  { %v175_v19 = vpop.f32.mrf.mxu2  ;;  %v185_v20 = vpop.f32.mrf.mxu3 }
  0xa6   :  { %v157_v21 = vpop.f32.mrf.mxu0  ;;  %v167_v22 = vpop.f32.mrf.mxu1  ;;  %v176_v31 = vadd.f32 %v382_v18, %v175_v19  ;;  %v186_v32 = vadd.f32 %v382_v18, %v185_v20 }
  0xa7   :  { %v158_v25 = vadd.f32 %v382_v18, %v157_v21  ;;  %v168_v26 = vadd.f32 %v382_v18, %v167_v22 }
  0xa9   :  { %v314_v27 = vpack.c.bf16 %v158_v25, %v156_v23  ;;  %v324_v28 = vpack.c.bf16 %v168_v26, %v166_v24 }
  0xab   :  { %315 = vst [vmem:[%s481_s3] sm:$0xff] %v314_v27  }
  0xac   :  { %352 = vst [vmem:[%s481_s3 + $0x10] sm:$0xff] %v324_v28  }
  0xad   :  { %v177_v29 = vpop.f32.mrf.mxu2  ;;  %v187_v30 = vpop.f32.mrf.mxu3 }
  0xae   :  { %v178_v33 = vadd.f32 %v382_v18, %v177_v29  ;;  %v188_v34 = vadd.f32 %v382_v18, %v187_v30  ;;  %v160_v35 = vpop.f32.mrf.mxu0  ;;  %v170_v36 = vpop.f32.mrf.mxu1 }
  0xaf   :  { %v161_v43 = vadd.f32 %v382_v18, %v160_v35  ;;  %v171_v44 = vadd.f32 %v382_v18, %v170_v36 }
  0xb0   :  { %v334_v37 = vpack.c.bf16 %v178_v33, %v176_v31  ;;  %v344_v38 = vpack.c.bf16 %v188_v34, %v186_v32 }
  0xb2   :  { %354 = vst [vmem:[%s481_s3 + $0x20] sm:$0xff] %v334_v37  }
  0xb3   :  { %356 = vst [vmem:[%s481_s3 + $0x30] sm:$0xff] %v344_v38  }
  0xb5   :  { %v180_v39 = vpop.f32.mrf.mxu2  ;;  %v190_v40 = vpop.f32.mrf.mxu3 }
  0xb6   :  { %v162_v41 = vpop.f32.mrf.mxu0  ;;  %v172_v42 = vpop.f32.mrf.mxu1  ;;  %v181_v51 = vadd.f32 %v382_v18, %v180_v39  ;;  %v191_v52 = vadd.f32 %v382_v18, %v190_v40 }
  0xb7   :  { %v163_v45 = vadd.f32 %v382_v18, %v162_v41  ;;  %v173_v46 = vadd.f32 %v382_v18, %v172_v42 }
  0xb9   :  { %v319_v47 = vpack.c.bf16 %v163_v45, %v161_v43  ;;  %v329_v48 = vpack.c.bf16 %v173_v46, %v171_v44 }
  0xbb   :  { %351 = vst [vmem:[%s481_s3 + $0x8] sm:$0xff] %v319_v47  }
  0xbc   :  { %353 = vst [vmem:[%s481_s3 + $0x18] sm:$0xff] %v329_v48  }
  0xbd   :  { %v182_v49 = vpop.f32.mrf.mxu2  ;;  %v192_v50 = vpop.f32.mrf.mxu3 }
  0xbe   :  { %v183_v53 = vadd.f32 %v382_v18, %v182_v49  ;;  %v193_v54 = vadd.f32 %v382_v18, %v192_v50 }
  0xc0   :  { %v339_v55 = vpack.c.bf16 %v183_v53, %v181_v51  ;;  %v349_v56 = vpack.c.bf16 %v193_v54, %v191_v52 }
  0xc2   :  { %355 = vst [vmem:[%s481_s3 + $0x28] sm:$0xff] %v339_v55  }
  0xc3   :  { %357 = vst [vmem:[%s481_s3 + $0x38] sm:$0xff] %v349_v56  }

// kernel: decoder_forward.5
= control target key start
LH: loop header
LB: loop body
LE: loop exit
PB: predicated region body
PF: predicated region fallthrough
CT: control target
= control target key end

     0   :  { %vm839_vm0 = vcmask 1040384   ;;  %s1915_s1 = inlined_call_operand.vmem [shape: bf16[128,128], index: 1, kind: input, shape index: {}]   ;;  %s1916_s2 = inlined_call_operand.vmem [shape: f32[1,128], index: 2, kind: input, shape index: {}]   ;;  %s1917_s0 = inlined_call_operand.vmem [shape: bf16[512,128], index: 0, kind: input, shape index: {}]   ;;  %s1918_s3 = inlined_call_operand.vmem [shape: bf16[512,128], index: 3, kind: output, shape index: {0}]   ;;  %s1919_s4 = inlined_call_operand.vmem [shape: f32[1,2,128], index: 4, kind: output, shape index: {1}]  }
   0x1   :  { %v1049_v0 = vld [vmem:[%s1915_s1 + $0x38] sm:$0xff]  ;;  %v1048_v1 = vld [vmem:[%s1915_s1 + $0x30] sm:$0xff]  ;;  %v1047_v2 = vld [vmem:[%s1915_s1 + $0x28] sm:$0xff] }
   0x2   :  { %340 = vmatpush.bf16.msra.mxu0 %v1049_v0  ;;  %1241 = vmatpush.bf16.msra.mxu1 %v1049_v0  ;;  %v1046_v3 = vld [vmem:[%s1915_s1 + $0x20] sm:$0xff]  ;;  %v1045_v4 = vld [vmem:[%s1915_s1 + $0x18] sm:$0xff]  ;;  %v1044_v5 = vld [vmem:[%s1915_s1 + $0x10] sm:$0xff] }
   0x3   :  { %1242 = vmatpush.bf16.msra.mxu2 %v1049_v0  ;;  %1243 = vmatpush.bf16.msra.mxu3 %v1049_v0  ;;  %v1043_v6 = vld [vmem:[%s1915_s1 + $0x8] sm:$0xff]  ;;  %v1042_v7 = vld [vmem:[%s1915_s1] sm:$0xff]  ;;  %v1012_v13 = vld [vmem:[%s1917_s0 + $0x10] sm:$0xff] }
   0x4   :  { %v1010_v8 = vld [vmem:[%s1917_s0] sm:$0xff]  ;;  %v1011_v10 = vld [vmem:[%s1917_s0 + $0x8] sm:$0xff]  ;;  %v1020_v14 = vld [vmem:[%s1917_s0 + $0x50] sm:$0xff] }
   0x5   :  { %v1018_v9 = vld [vmem:[%s1917_s0 + $0x40] sm:$0xff]  ;;  %v1019_v11 = vld [vmem:[%s1917_s0 + $0x48] sm:$0xff]  ;;  %v1013_v16 = vld [vmem:[%s1917_s0 + $0x18] sm:$0xff] }
   0x6   :  { %341 = vmatpush.bf16.msra.mxu0 %v1048_v1  ;;  %1244 = vmatpush.bf16.msra.mxu1 %v1048_v1  ;;  %v1026_v12 = vld [vmem:[%s1917_s0 + $0x80] sm:$0xff]  ;;  %v1027_v15 = vld [vmem:[%s1917_s0 + $0x88] sm:$0xff]  ;;  %v1021_v17 = vld [vmem:[%s1917_s0 + $0x58] sm:$0xff] }
   0x7   :  { %1245 = vmatpush.bf16.msra.mxu2 %v1048_v1  ;;  %1246 = vmatpush.bf16.msra.mxu3 %v1048_v1  ;;  %v1028_v18 = vld [vmem:[%s1917_s0 + $0x90] sm:$0xff]  ;;  %v1034_v19 = vld [vmem:[%s1917_s0 + $0xc0] sm:$0xff]  ;;  %v1029_v22 = vld [vmem:[%s1917_s0 + $0x98] sm:$0xff] }
   0x8   :  { %v1014_v20 = vld [vmem:[%s1917_s0 + $0x20] sm:$0xff]  ;;  %v1035_v23 = vld [vmem:[%s1917_s0 + $0xc8] sm:$0xff]  ;;  %v1036_v27 = vld [vmem:[%s1917_s0 + $0xd0] sm:$0xff] }
   0x9   :  { %v1022_v21 = vld [vmem:[%s1917_s0 + $0x60] sm:$0xff]  ;;  %v1015_v24 = vld [vmem:[%s1917_s0 + $0x28] sm:$0xff]  ;;  %v1016_v28 = vld [vmem:[%s1917_s0 + $0x30] sm:$0xff] }
   0xa   :  { %342 = vmatpush.bf16.msra.mxu0 %v1047_v2  ;;  %1247 = vmatpush.bf16.msra.mxu1 %v1047_v2  ;;  %v1023_v25 = vld [vmem:[%s1917_s0 + $0x68] sm:$0xff]  ;;  %v1030_v26 = vld [vmem:[%s1917_s0 + $0xa0] sm:$0xff]  ;;  %v1024_v29 = vld [vmem:[%s1917_s0 + $0x70] sm:$0xff] }
   0xb   :  { %1248 = vmatpush.bf16.msra.mxu2 %v1047_v2  ;;  %1249 = vmatpush.bf16.msra.mxu3 %v1047_v2  ;;  %v1031_v30 = vld [vmem:[%s1917_s0 + $0xa8] sm:$0xff]  ;;  %v1037_v31 = vld [vmem:[%s1917_s0 + $0xd8] sm:$0xff]  ;;  %v1032_v34 = vld [vmem:[%s1917_s0 + $0xb0] sm:$0xff] }
   0xc   :  { %v1017_v32 = vld [vmem:[%s1917_s0 + $0x38] sm:$0xff]  ;;  %v1038_v35 = vld [vmem:[%s1917_s0 + $0xe0] sm:$0xff]  ;;  %v1039_v40 = vld [vmem:[%s1917_s0 + $0xe8] sm:$0xff] }
   0xd   :  { %v1025_v33 = vld [vmem:[%s1917_s0 + $0x78] sm:$0xff]  ;;  %v1402_v38 = vld [vmem:[%s1916_s2] ss:$0 sm:$0xff]  ;;  %v1040_v58 = vld [vmem:[%s1917_s0 + $0xf0] sm:$0xff] }
   0xe   :  { %343 = vmatpush.bf16.msra.mxu0 %v1046_v3  ;;  %1250 = vmatpush.bf16.msra.mxu1 %v1046_v3  ;;  %v1033_v39 = vld [vmem:[%s1917_s0 + $0xb8] sm:$0xff] }
   0xf   :  { %1251 = vmatpush.bf16.msra.mxu2 %v1046_v3  ;;  %1252 = vmatpush.bf16.msra.mxu3 %v1046_v3 }
  0x12   :  { %344 = vmatpush.bf16.msra.mxu0 %v1045_v4  ;;  %1253 = vmatpush.bf16.msra.mxu1 %v1045_v4 }
  0x13   :  { %1254 = vmatpush.bf16.msra.mxu2 %v1045_v4  ;;  %1255 = vmatpush.bf16.msra.mxu3 %v1045_v4 }
  0x16   :  { %345 = vmatpush.bf16.msra.mxu0 %v1044_v5  ;;  %1256 = vmatpush.bf16.msra.mxu1 %v1044_v5 }
  0x17   :  { %1257 = vmatpush.bf16.msra.mxu2 %v1044_v5  ;;  %1258 = vmatpush.bf16.msra.mxu3 %v1044_v5 }
  0x1a   :  { %346 = vmatpush.bf16.msra.mxu0 %v1043_v6  ;;  %1259 = vmatpush.bf16.msra.mxu1 %v1043_v6 }
  0x1b   :  { %1260 = vmatpush.bf16.msra.mxu2 %v1043_v6  ;;  %1261 = vmatpush.bf16.msra.mxu3 %v1043_v6 }
  0x1e   :  { %347 = vmatpush.bf16.msra.mxu0 %v1042_v7  ;;  %1262 = vmatpush.bf16.msra.mxu1 %v1042_v7 }
  0x1f   :  { %1263 = vmatpush.bf16.msra.mxu2 %v1042_v7  ;;  %1264 = vmatpush.bf16.msra.mxu3 %v1042_v7 }
  0x21   :  { %348 = vmatmul.bf16.vlgmr.msra.gmra.mxu0 %v1010_v8  ;;  %388 = vmatmul.bf16.vlgmr.msra.gmra.mxu1 %v1018_v9 }
  0x22   :  { %428 = vmatmul.bf16.vlgmr.msra.gmra.mxu2 %v1026_v12  ;;  %468 = vmatmul.bf16.vlgmr.msra.gmra.mxu3 %v1034_v19  ;;  %v1041_v12 = vld [vmem:[%s1917_s0 + $0xf8] sm:$0xff] }
  0x31   :  { %353 = vmatmul.bf16.gmra.mxu0 %v1011_v10  ;;  %393 = vmatmul.bf16.gmra.mxu1 %v1019_v11 }
  0x32   :  { %433 = vmatmul.bf16.gmra.mxu2 %v1027_v15  ;;  %473 = vmatmul.bf16.gmra.mxu3 %v1035_v23 }
  0x41   :  { %358 = vmatmul.bf16.gmra.mxu0 %v1012_v13  ;;  %398 = vmatmul.bf16.gmra.mxu1 %v1020_v14 }
  0x42   :  { %438 = vmatmul.bf16.gmra.mxu2 %v1028_v18  ;;  %478 = vmatmul.bf16.gmra.mxu3 %v1036_v27 }
  0x51   :  { %363 = vmatmul.bf16.gmra.mxu0 %v1013_v16  ;;  %403 = vmatmul.bf16.gmra.mxu1 %v1021_v17 }
  0x52   :  { %443 = vmatmul.bf16.gmra.mxu2 %v1029_v22  ;;  %483 = vmatmul.bf16.gmra.mxu3 %v1037_v31 }
  0x61   :  { %368 = vmatmul.bf16.gmra.mxu0 %v1014_v20  ;;  %408 = vmatmul.bf16.gmra.mxu1 %v1022_v21 }
  0x62   :  { %448 = vmatmul.bf16.gmra.mxu2 %v1030_v26  ;;  %488 = vmatmul.bf16.gmra.mxu3 %v1038_v35 }
  0x71   :  { %373 = vmatmul.bf16.gmra.mxu0 %v1015_v24  ;;  %413 = vmatmul.bf16.gmra.mxu1 %v1023_v25 }
  0x72   :  { %453 = vmatmul.bf16.gmra.mxu2 %v1031_v30  ;;  %493 = vmatmul.bf16.gmra.mxu3 %v1039_v40 }
  0x81   :  { %378 = vmatmul.bf16.gmra.mxu0 %v1016_v28  ;;  %418 = vmatmul.bf16.gmra.mxu1 %v1024_v29 }
  0x82   :  { %458 = vmatmul.bf16.gmra.mxu2 %v1032_v34  ;;  %498 = vmatmul.bf16.gmra.mxu3 %v1040_v58 }
  0x91   :  { %383 = vmatmul.bf16.gmra.mxu0 %v1017_v32  ;;  %423 = vmatmul.bf16.gmra.mxu1 %v1025_v33 }
  0x92   :  { %463 = vmatmul.bf16.gmra.mxu2 %v1033_v39  ;;  %503 = vmatmul.bf16.gmra.mxu3 %v1041_v12 }
  0x9e   :  { %v349_v36 = vpop.f32.mrf.mxu0  ;;  %v389_v37 = vpop.f32.mrf.mxu1 }
  0x9f   :  { %v350_v41 = vadd.f32 %v1402_v38, %v349_v36  ;;  %v1412_v42 = vadd.f32 %v1402_v38, %v389_v37 }
  0xa1   :  { %v706_v47 = vmul.f32 %v350_v41, %v350_v41 }
  0xa5   :  { %v429_v1 = vpop.f32.mrf.mxu2  ;;  %v469_v36 = vpop.f32.mrf.mxu3 }
  0xa6   :  { %v351_v43 = vpop.f32.mrf.mxu0  ;;  %v391_v44 = vpop.f32.mrf.mxu1  ;;  %v1450_v9 = vadd.f32 %v1402_v38, %v429_v1 }
  0xa7   :  { %v352_v45 = vadd.f32 %v1402_v38, %v351_v43  ;;  %v1416_v46 = vadd.f32 %v1402_v38, %v391_v44  ;;  %v1522_v44 = vadd.f32 %v1402_v38, %v469_v36 }
  0xa9   :  { %v1053_v48 = vpack.c.bf16 %v352_v45, %v350_v41  ;;  %v637_v49 = vadd.f32 %v352_v45, %v350_v41  ;;  %v707_v50 = vmul.f32 %v352_v45, %v352_v45  ;;  %v1093_v51 = vpack.c.bf16 %v1416_v46, %v1412_v42 }
  0xab   :  { %1054 = vst [vmem:[%s1918_s3] sm:$0xff] %v1053_v48   ;;  %v770_v52 = vadd.f32 %v707_v50, %v706_v47 }
  0xac   :  { %1217 = vst [vmem:[%s1918_s3 + $0x40] sm:$0xff] %v1093_v51  }
  0xad   :  { %v431_v10 = vpop.f32.mrf.mxu2  ;;  %v471_v47 = vpop.f32.mrf.mxu3 }
  0xae   :  { %v354_v53 = vpop.f32.mrf.mxu0  ;;  %v394_v54 = vpop.f32.mrf.mxu1  ;;  %v1453_v11 = vadd.f32 %v1402_v38, %v431_v10 }
  0xaf   :  { %v355_v55 = vadd.f32 %v1402_v38, %v354_v53  ;;  %v1431_v60 = vadd.f32 %v1402_v38, %v394_v54 }
  0xb0   :  { %v1133_v13 = vpack.c.bf16 %v1453_v11, %v1450_v9 }
  0xb1   :  { %v638_v56 = vadd.f32 %v637_v49, %v355_v55  ;;  %v708_v57 = vmul.f32 %v355_v55, %v355_v55  ;;  %v1528_v49 = vadd.f32 %v1402_v38, %v471_v47 }
  0xb2   :  { %1225 = vst [vmem:[%s1918_s3 + $0x80] sm:$0xff] %v1133_v13  }
  0xb3   :  { %v771_v59 = vadd.f32 %v770_v52, %v708_v57  ;;  %v1173_v51 = vpack.c.bf16 %v1528_v49, %v1522_v44 }
  0xb5   :  { %v434_v20 = vpop.f32.mrf.mxu2  ;;  %1233 = vst [vmem:[%s1918_s3 + $0xc0] sm:$0xff] %v1173_v51  }
  0xb6   :  { %v356_v61 = vpop.f32.mrf.mxu0  ;;  %v396_v62 = vpop.f32.mrf.mxu1  ;;  %v1486_v25 = vadd.f32 %v1402_v38, %v434_v20 }
  0xb7   :  { %v357_v63 = vadd.f32 %v1402_v38, %v356_v61  ;;  %v1435_v0 = vadd.f32 %v1402_v38, %v396_v62 }
  0xb9   :  { %v1058_v2 = vpack.c.bf16 %v357_v63, %v355_v55  ;;  %v1437_v3 = vadd.f32 %v638_v56, %v357_v63  ;;  %v709_v4 = vmul.f32 %v357_v63, %v357_v63  ;;  %v1098_v5 = vpack.c.bf16 %v1435_v0, %v1431_v60 }
  0xbb   :  { %1210 = vst [vmem:[%s1918_s3 + $0x8] sm:$0xff] %v1058_v2   ;;  %v1444_v6 = vadd.f32 %v771_v59, %v709_v4  ;;  %v474_v59 = vpop.f32.mrf.mxu3 }
  0xbc   :  { %1218 = vst [vmem:[%s1918_s3 + $0x48] sm:$0xff] %v1098_v5   ;;  %v1566_v4 = vadd.f32 %v1402_v38, %v474_v59 }
  0xbd   :  { %v436_v26 = vpop.f32.mrf.mxu2 }
  0xbe   :  { %v359_v7 = vpop.f32.mrf.mxu0  ;;  %v399_v8 = vpop.f32.mrf.mxu1  ;;  %v1489_v27 = vadd.f32 %v1402_v38, %v436_v26 }
  0xbf   :  { %v1464_v14 = vadd.f32 %v1402_v38, %v399_v8  ;;  %v1467_v17 = vadd.f32 %v1402_v38, %v359_v7 }
  0xc0   :  { %v1138_v28 = vpack.c.bf16 %v1489_v27, %v1486_v25 }
  0xc1   :  { %v640_v51 = vadd.f32 %v1437_v3, %v1467_v17 }
  0xc2   :  { %1226 = vst [vmem:[%s1918_s3 + $0x88] sm:$0xff] %v1138_v28  }
  0xc3   :  { %v476_v7 = vpop.f32.mrf.mxu3 }
  0xc4   :  { %v1572_v10 = vadd.f32 %v1402_v38, %v476_v7 }
  0xc5   :  { %v439_v35 = vpop.f32.mrf.mxu2 }
  0xc6   :  { %v361_v15 = vpop.f32.mrf.mxu0  ;;  %v401_v16 = vpop.f32.mrf.mxu1  ;;  %v1519_v43 = vadd.f32 %v1402_v38, %v439_v35  ;;  %v1178_v13 = vpack.c.bf16 %v1572_v10, %v1566_v4 }
  0xc7   :  { %v1470_v18 = vadd.f32 %v1402_v38, %v361_v15  ;;  %v1473_v19 = vadd.f32 %v1402_v38, %v401_v16 }
  0xc8   :  { %1234 = vst [vmem:[%s1918_s3 + $0xc8] sm:$0xff] %v1178_v13  }
  0xc9   :  { %v1063_v21 = vpack.c.bf16 %v1470_v18, %v1467_v17  ;;  %v1103_v22 = vpack.c.bf16 %v1473_v19, %v1464_v14 }
  0xcb   :  { %1211 = vst [vmem:[%s1918_s3 + $0x10] sm:$0xff] %v1063_v21   ;;  %v479_v26 = vpop.f32.mrf.mxu3 }
  0xcc   :  { %1219 = vst [vmem:[%s1918_s3 + $0x50] sm:$0xff] %v1103_v22  }
  0xcd   :  { %v441_v45 = vpop.f32.mrf.mxu2 }
  0xce   :  { %v364_v23 = vpop.f32.mrf.mxu0  ;;  %v404_v24 = vpop.f32.mrf.mxu1  ;;  %v1525_v48 = vadd.f32 %v1402_v38, %v441_v45  ;;  %v711_v45 = vmul.f32 %v1470_v18, %v1470_v18 }
  0xcf   :  { %v1497_v29 = vadd.f32 %v1402_v38, %v404_v24  ;;  %v1500_v32 = vadd.f32 %v1402_v38, %v364_v23 }
  0xd0   :  { %v1143_v50 = vpack.c.bf16 %v1525_v48, %v1519_v43 }
  0xd2   :  { %1227 = vst [vmem:[%s1918_s3 + $0x90] sm:$0xff] %v1143_v50  }
  0xd5   :  { %v444_v58 = vpop.f32.mrf.mxu2 }
  0xd6   :  { %v366_v30 = vpop.f32.mrf.mxu0  ;;  %v406_v31 = vpop.f32.mrf.mxu1  ;;  %v1563_v2 = vadd.f32 %v1402_v38, %v444_v58 }
  0xd7   :  { %v1503_v33 = vadd.f32 %v1402_v38, %v366_v30  ;;  %v1506_v34 = vadd.f32 %v1402_v38, %v406_v31  ;;  %v710_v31 = vmul.f32 %v1467_v17, %v1467_v17 }
  0xd9   :  { %v1068_v37 = vpack.c.bf16 %v1503_v33, %v1500_v32  ;;  %v1108_v39 = vpack.c.bf16 %v1506_v34, %v1497_v29  ;;  %v713_v3 = vmul.f32 %v1503_v33, %v1503_v33 }
  0xdb   :  { %1212 = vst [vmem:[%s1918_s3 + $0x18] sm:$0xff] %v1068_v37  }
  0xdc   :  { %1220 = vst [vmem:[%s1918_s3 + $0x58] sm:$0xff] %v1108_v39   ;;  %v1609_v39 = vadd.f32 %v1402_v38, %v479_v26 }
  0xdd   :  { %v446_v5 = vpop.f32.mrf.mxu2 }
  0xde   :  { %v369_v40 = vpop.f32.mrf.mxu0  ;;  %v409_v41 = vpop.f32.mrf.mxu1  ;;  %v1569_v8 = vadd.f32 %v1402_v38, %v446_v5 }
  0xdf   :  { %v1538_v52 = vadd.f32 %v1402_v38, %v409_v41  ;;  %v1544_v55 = vadd.f32 %v1402_v38, %v369_v40  ;;  %v481_v41 = vpop.f32.mrf.mxu3 }
  0xe0   :  { %v1148_v12 = vpack.c.bf16 %v1569_v8, %v1563_v2  ;;  %v1617_v50 = vadd.f32 %v1402_v38, %v481_v41 }
  0xe1   :  { %v714_v5 = vmul.f32 %v1544_v55, %v1544_v55 }
  0xe2   :  { %1228 = vst [vmem:[%s1918_s3 + $0x98] sm:$0xff] %v1148_v12   ;;  %v1183_v59 = vpack.c.bf16 %v1617_v50, %v1609_v39 }
  0xe4   :  { %1235 = vst [vmem:[%s1918_s3 + $0xd0] sm:$0xff] %v1183_v59  }
  0xe5   :  { %v449_v24 = vpop.f32.mrf.mxu2 }
  0xe6   :  { %v371_v53 = vpop.f32.mrf.mxu0  ;;  %v411_v54 = vpop.f32.mrf.mxu1  ;;  %v1606_v37 = vadd.f32 %v1402_v38, %v449_v24 }
  0xe7   :  { %v1547_v56 = vadd.f32 %v1402_v38, %v371_v53  ;;  %v1550_v57 = vadd.f32 %v1402_v38, %v411_v54  ;;  %v773_v53 = vadd.f32 %v1444_v6, %v710_v31  ;;  %v712_v54 = vmul.f32 %v1500_v32, %v1500_v32 }
  0xe9   :  { %v1073_v61 = vpack.c.bf16 %v1547_v56, %v1544_v55  ;;  %v1113_v62 = vpack.c.bf16 %v1550_v57, %v1538_v52 }
  0xeb   :  { %1213 = vst [vmem:[%s1918_s3 + $0x20] sm:$0xff] %v1073_v61   ;;  %v641_v61 = vadd.f32 %v640_v51, %v1470_v18 }
  0xec   :  { %1221 = vst [vmem:[%s1918_s3 + $0x60] sm:$0xff] %v1113_v62   ;;  %v774_v62 = vadd.f32 %v773_v53, %v711_v45 }
  0xed   :  { %v451_v40 = vpop.f32.mrf.mxu2  ;;  %v642_v17 = vadd.f32 %v641_v61, %v1500_v32  ;;  %v715_v32 = vmul.f32 %v1547_v56, %v1547_v56 }
  0xee   :  { %v374_v63 = vpop.f32.mrf.mxu0  ;;  %v414_v1 = vpop.f32.mrf.mxu1  ;;  %v1614_v47 = vadd.f32 %v1402_v38, %v451_v40 }
  0xef   :  { %v1582_v15 = vadd.f32 %v1402_v38, %v414_v1  ;;  %v375_v21 = vadd.f32 %v1402_v38, %v374_v63  ;;  %v775_v63 = vadd.f32 %v774_v62, %v712_v54  ;;  %v643_v24 = vadd.f32 %v642_v17, %v1503_v33 }
  0xf0   :  { %v1153_v58 = vpack.c.bf16 %v1614_v47, %v1606_v37 }
  0xf1   :  { %v776_v26 = vadd.f32 %v775_v63, %v713_v3  ;;  %v644_v31 = vadd.f32 %v643_v24, %v1544_v55 }
  0xf2   :  { %1229 = vst [vmem:[%s1918_s3 + $0xa0] sm:$0xff] %v1153_v58  }
  0xf3   :  { %v645_v33 = vadd.f32 %v644_v31, %v1547_v56 }
  0xf5   :  { %v646_v53 = vadd.f32 %v645_v33, %v375_v21 }
  0xf6   :  { %v376_v16 = vpop.f32.mrf.mxu0  ;;  %v416_v20 = vpop.f32.mrf.mxu1 }
  0xf7   :  { %v1589_v22 = vadd.f32 %v1402_v38, %v376_v16  ;;  %v1592_v23 = vadd.f32 %v1402_v38, %v416_v20  ;;  %v454_v16 = vpop.f32.mrf.mxu2  ;;  %v484_v20 = vpop.f32.mrf.mxu3 }
  0xf8   :  { %v1664_v54 = vadd.f32 %v1402_v38, %v454_v16  ;;  %v1667_v58 = vadd.f32 %v1402_v38, %v484_v20 }
  0xf9   :  { %v1078_v28 = vpack.c.bf16 %v1589_v22, %v375_v21  ;;  %v1118_v30 = vpack.c.bf16 %v1592_v23, %v1582_v15  ;;  %v717_v41 = vmul.f32 %v1589_v22, %v1589_v22 }
  0xfb   :  { %1214 = vst [vmem:[%s1918_s3 + $0x28] sm:$0xff] %v1078_v28  }
  0xfc   :  { %1222 = vst [vmem:[%s1918_s3 + $0x68] sm:$0xff] %v1118_v30  }
  0xfe   :  { %v379_v35 = vpop.f32.mrf.mxu0  ;;  %v419_v36 = vpop.f32.mrf.mxu1 }
  0xff   :  { %v1635_v6 = vadd.f32 %v1402_v38, %v419_v36  ;;  %v380_v7 = vadd.f32 %v1402_v38, %v379_v35  ;;  %v777_v35 = vadd.f32 %v776_v26, %v714_v5  ;;  %v716_v36 = vmul.f32 %v375_v21, %v375_v21  ;;  %v456_v59 = vpop.f32.mrf.mxu2  ;;  %v486_v61 = vpop.f32.mrf.mxu3 }
 0x100   :  { %v1671_v56 = vadd.f32 %v1402_v38, %v456_v59  ;;  %v1674_v17 = vadd.f32 %v1402_v38, %v486_v61  ;;  %v647_v21 = vadd.f32 %v646_v53, %v1589_v22  ;;  %v722_v53 = vmul.f32 %v1412_v42, %v1412_v42 }
 0x101   :  { %v778_v40 = vadd.f32 %v777_v35, %v715_v32  ;;  %v718_v62 = vmul.f32 %v380_v7, %v380_v7  ;;  %v723_v61 = vmul.f32 %v1416_v46, %v1416_v46 }
 0x102   :  { %v1188_v5 = vpack.c.bf16 %v1674_v17, %v1667_v58  ;;  %v648_v16 = vadd.f32 %v647_v21, %v380_v7  ;;  %v724_v21 = vmul.f32 %v1431_v60, %v1431_v60 }
 0x103   :  { %v779_v55 = vadd.f32 %v778_v40, %v716_v36 }
 0x104   :  { %1236 = vst [vmem:[%s1918_s3 + $0xd8] sm:$0xff] %v1188_v5  }
 0x105   :  { %v780_v63 = vadd.f32 %v779_v55, %v717_v41 }
 0x106   :  { %v381_v1 = vpop.f32.mrf.mxu0  ;;  %v421_v18 = vpop.f32.mrf.mxu1 }
 0x107   :  { %v382_v12 = vadd.f32 %v1402_v38, %v381_v1  ;;  %v1646_v13 = vadd.f32 %v1402_v38, %v421_v18  ;;  %v1158_v18 = vpack.c.bf16 %v1671_v56, %v1664_v54  ;;  %v781_v20 = vadd.f32 %v780_v63, %v718_v62  ;;  %v459_v36 = vpop.f32.mrf.mxu2  ;;  %v489_v33 = vpop.f32.mrf.mxu3 }
 0x109   :  { %v1083_v28 = vpack.c.bf16 %v382_v12, %v380_v7  ;;  %v1123_v30 = vpack.c.bf16 %v1646_v13, %v1635_v6  ;;  %v719_v1 = vmul.f32 %v382_v12, %v382_v12  ;;  %1230 = vst [vmem:[%s1918_s3 + $0xa8] sm:$0xff] %v1158_v18   ;;  %v649_v26 = vadd.f32 %v648_v16, %v382_v12 }
 0x10a   :  { %v1712_v18 = vadd.f32 %v1402_v38, %v459_v36 }
 0x10b   :  { %1215 = vst [vmem:[%s1918_s3 + $0x30] sm:$0xff] %v1083_v28   ;;  %v782_v22 = vadd.f32 %v781_v20, %v719_v1 }
 0x10c   :  { %1223 = vst [vmem:[%s1918_s3 + $0x70] sm:$0xff] %v1123_v30  }
 0x10e   :  { %v384_v45 = vpop.f32.mrf.mxu0  ;;  %v424_v51 = vpop.f32.mrf.mxu1 }
 0x10f   :  { %v385_v3 = vadd.f32 %v1402_v38, %v384_v45  ;;  %v1685_v32 = vadd.f32 %v1402_v38, %v424_v51  ;;  %v461_v5 = vpop.f32.mrf.mxu2  ;;  %v491_v16 = vpop.f32.mrf.mxu3 }
 0x110   :  { %v1718_v20 = vadd.f32 %v1402_v38, %v461_v5 }
 0x111   :  { %v720_v24 = vmul.f32 %v385_v3, %v385_v3  ;;  %v650_v31 = vadd.f32 %v649_v26, %v385_v3 }
 0x113   :  { %v783_v40 = vadd.f32 %v782_v22, %v720_v24  ;;  %v725_v24 = vmul.f32 %v1435_v0, %v1435_v0  ;;  %v1163_v22 = vpack.c.bf16 %v1718_v20, %v1712_v18 }
 0x115   :  { %1231 = vst [vmem:[%s1918_s3 + $0xb0] sm:$0xff] %v1163_v22  }
 0x116   :  { %v386_v28 = vpop.f32.mrf.mxu0  ;;  %v426_v30 = vpop.f32.mrf.mxu1 }
 0x117   :  { %v387_v7 = vadd.f32 %v1402_v38, %v386_v28  ;;  %v1692_v35 = vadd.f32 %v1402_v38, %v426_v30  ;;  %v726_v30 = vmul.f32 %v1464_v14, %v1464_v14 }
 0x119   :  { %v1088_v12 = vpack.c.bf16 %v387_v7, %v385_v3  ;;  %v651_v41 = vadd.f32 %v650_v31, %v387_v7  ;;  %v721_v45 = vmul.f32 %v387_v7, %v387_v7  ;;  %v1128_v51 = vpack.c.bf16 %v1692_v35, %v1685_v32 }
 0x11b   :  { %1216 = vst [vmem:[%s1918_s3 + $0x38] sm:$0xff] %v1088_v12   ;;  %v652_v55 = vadd.f32 %v651_v41, %v1412_v42  ;;  %v784_v59 = vadd.f32 %v783_v40, %v721_v45  ;;  %v1715_v42 = vadd.f32 %v1402_v38, %v489_v33  ;;  %v728_v40 = vmul.f32 %v1497_v29, %v1497_v29  ;;  %v464_v41 = vpop.f32.mrf.mxu2  ;;  %v494_v45 = vpop.f32.mrf.mxu3 }
 0x11c   :  { %1224 = vst [vmem:[%s1918_s3 + $0x78] sm:$0xff] %v1128_v51   ;;  %v729_v51 = vmul.f32 %v1506_v34, %v1506_v34  ;;  %v1761_v5 = vadd.f32 %v1402_v38, %v494_v45  ;;  %v737_v45 = vmul.f32 %v1692_v35, %v1692_v35 }
 0x11d   :  { %v653_v62 = vadd.f32 %v652_v55, %v1416_v46  ;;  %v785_v3 = vadd.f32 %v784_v59, %v722_v53  ;;  %v1721_v46 = vadd.f32 %v1402_v38, %v491_v16 }
 0x11f   :  { %v654_v63 = vadd.f32 %v653_v62, %v1431_v60  ;;  %v786_v1 = vadd.f32 %v785_v3, %v723_v61  ;;  %v1193_v28 = vpack.c.bf16 %v1721_v46, %v1715_v42  ;;  %v731_v62 = vmul.f32 %v1550_v57, %v1550_v57 }
 0x121   :  { %v655_v60 = vadd.f32 %v654_v63, %v1435_v0  ;;  %v787_v26 = vadd.f32 %v786_v1, %v724_v21  ;;  %v727_v0 = vmul.f32 %v1473_v19, %v1473_v19  ;;  %1237 = vst [vmem:[%s1918_s3 + $0xe0] sm:$0xff] %v1193_v28   ;;  %v732_v21 = vmul.f32 %v1582_v15, %v1582_v15 }
 0x123   :  { %v656_v31 = vadd.f32 %v655_v60, %v1464_v14  ;;  %v788_v7 = vadd.f32 %v787_v26, %v725_v24  ;;  %v496_v16 = vpop.f32.mrf.mxu3  ;;  %v733_v60 = vmul.f32 %v1592_v23, %v1592_v23 }
 0x125   :  { %v657_v36 = vadd.f32 %v656_v31, %v1473_v19  ;;  %v789_v33 = vadd.f32 %v788_v7, %v726_v30  ;;  %v730_v19 = vmul.f32 %v1538_v52, %v1538_v52  ;;  %v734_v31 = vmul.f32 %v1635_v6, %v1635_v6 }
 0x127   :  { %v790_v12 = vadd.f32 %v789_v33, %v727_v0  ;;  %v658_v14 = vadd.f32 %v657_v36, %v1497_v29  ;;  %v735_v36 = vmul.f32 %v1646_v13, %v1646_v13 }
 0x129   :  { %v659_v53 = vadd.f32 %v658_v14, %v1506_v34  ;;  %v791_v55 = vadd.f32 %v790_v12, %v728_v40  ;;  %v1758_v34 = vadd.f32 %v1402_v38, %v464_v41 }
 0x12b   :  { %v660_v59 = vadd.f32 %v659_v53, %v1538_v52  ;;  %v792_v61 = vadd.f32 %v791_v55, %v729_v51  ;;  %v466_v52 = vpop.f32.mrf.mxu2  ;;  %v499_v12 = vpop.f32.mrf.mxu3  ;;  %v739_v55 = vmul.f32 %v1453_v11, %v1453_v11 }
 0x12c   :  { %v1764_v24 = vadd.f32 %v1402_v38, %v466_v52 }
 0x12d   :  { %v661_v3 = vadd.f32 %v660_v59, %v1550_v57  ;;  %v793_v29 = vadd.f32 %v792_v61, %v730_v19  ;;  %v1767_v57 = vadd.f32 %v1402_v38, %v496_v16  ;;  %v743_v16 = vmul.f32 %v1525_v48, %v1525_v48 }
 0x12e   :  { %v1168_v22 = vpack.c.bf16 %v1764_v24, %v1758_v34 }
 0x12f   :  { %v662_v63 = vadd.f32 %v661_v3, %v1582_v15  ;;  %v794_v1 = vadd.f32 %v793_v29, %v731_v62  ;;  %v1198_v28 = vpack.c.bf16 %v1767_v57, %v1761_v5 }
 0x130   :  { %1232 = vst [vmem:[%s1918_s3 + $0xb8] sm:$0xff] %v1168_v22  }
 0x131   :  { %v663_v15 = vadd.f32 %v662_v63, %v1592_v23  ;;  %v795_v26 = vadd.f32 %v794_v1, %v732_v21  ;;  %1238 = vst [vmem:[%s1918_s3 + $0xe8] sm:$0xff] %v1198_v28  }
 0x133   :  { %v664_v30 = vadd.f32 %v663_v15, %v1635_v6  ;;  %v796_v7 = vadd.f32 %v795_v26, %v733_v60  ;;  %v736_v6 = vmul.f32 %v1685_v32, %v1685_v32  ;;  %v501_v3 = vpop.f32.mrf.mxu3  ;;  %v744_v15 = vmul.f32 %v1563_v2, %v1563_v2 }
 0x134   :  { %v1807_v29 = vadd.f32 %v1402_v38, %v501_v3 }
 0x135   :  { %v797_v0 = vadd.f32 %v796_v7, %v734_v31  ;;  %v665_v23 = vadd.f32 %v664_v30, %v1646_v13  ;;  %v738_v13 = vmul.f32 %v1450_v9, %v1450_v9  ;;  %v746_v7 = vmul.f32 %v1606_v37, %v1606_v37 }
 0x137   :  { %v798_v33 = vadd.f32 %v797_v0, %v735_v36  ;;  %v666_v40 = vadd.f32 %v665_v23, %v1685_v32  ;;  %v740_v32 = vmul.f32 %v1486_v25, %v1486_v25 }
 0x139   :  { %v799_v14 = vadd.f32 %v798_v33, %v736_v6  ;;  %v667_v41 = vadd.f32 %v666_v40, %v1692_v35  ;;  %v1804_v35 = vadd.f32 %v1402_v38, %v499_v12  ;;  %v748_v33 = vmul.f32 %v1664_v54, %v1664_v54 }
 0x13b   :  { %v668_v51 = vadd.f32 %v667_v41, %v1450_v9  ;;  %v800_v53 = vadd.f32 %v799_v14, %v737_v45  ;;  %v741_v9 = vmul.f32 %v1489_v27, %v1489_v27  ;;  %v1203_v63 = vpack.c.bf16 %v1807_v29, %v1804_v35  ;;  %v504_v28 = vpop.f32.mrf.mxu3 }
 0x13c   :  { %v749_v41 = vmul.f32 %v1671_v56, %v1671_v56 }
 0x13d   :  { %v669_v19 = vadd.f32 %v668_v51, %v1453_v11  ;;  %v801_v59 = vadd.f32 %v800_v53, %v738_v13  ;;  %1239 = vst [vmem:[%s1918_s3 + $0xf0] sm:$0xff] %v1203_v63   ;;  %v750_v51 = vmul.f32 %v1712_v18, %v1712_v18 }
 0x13f   :  { %v670_v61 = vadd.f32 %v669_v19, %v1486_v25  ;;  %v802_v62 = vadd.f32 %v801_v59, %v739_v55  ;;  %v742_v25 = vmul.f32 %v1519_v43, %v1519_v43  ;;  %v752_v59 = vmul.f32 %v1758_v34, %v1758_v34 }
 0x141   :  { %v671_v21 = vadd.f32 %v670_v61, %v1489_v27  ;;  %v803_v11 = vadd.f32 %v802_v62, %v740_v32  ;;  %v754_v62 = vmul.f32 %v1522_v44, %v1522_v44 }
 0x143   :  { %v672_v1 = vadd.f32 %v671_v21, %v1519_v43  ;;  %v804_v52 = vadd.f32 %v803_v11, %v741_v9  ;;  %v745_v43 = vmul.f32 %v1569_v8, %v1569_v8  ;;  %v506_v12 = vpop.f32.mrf.mxu3 }
 0x144   :  { %v1842_v14 = vadd.f32 %v1402_v38, %v506_v12  ;;  %v767_v12 = vmul.f32 %v1807_v29, %v1807_v29 }
 0x145   :  { %v805_v60 = vadd.f32 %v804_v52, %v742_v25  ;;  %v673_v27 = vadd.f32 %v672_v1, %v1525_v48  ;;  %v747_v48 = vmul.f32 %v1614_v47, %v1614_v47 }
 0x147   :  { %v674_v26 = vadd.f32 %v673_v27, %v1563_v2  ;;  %v806_v22 = vadd.f32 %v805_v60, %v743_v16 }
 0x149   :  { %v675_v30 = vadd.f32 %v674_v26, %v1569_v8  ;;  %v807_v31 = vadd.f32 %v806_v22, %v744_v15  ;;  %v1839_v8 = vadd.f32 %v1402_v38, %v504_v28 }
 0x14b   :  { %v676_v0 = vadd.f32 %v675_v30, %v1606_v37  ;;  %v808_v23 = vadd.f32 %v807_v31, %v745_v43  ;;  %v1208_v45 = vpack.c.bf16 %v1842_v14, %v1839_v8 }
 0x14d   :  { %v677_v36 = vadd.f32 %v676_v0, %v1614_v47  ;;  %v809_v2 = vadd.f32 %v808_v23, %v746_v7  ;;  %1240 = vst [vmem:[%s1918_s3 + $0xf8] sm:$0xff] %v1208_v45   ;;  %v769_v45 = vmul.f32 %v1842_v14, %v1842_v14 }
 0x14f   :  { %v678_v40 = vadd.f32 %v677_v36, %v1664_v54  ;;  %v810_v6 = vadd.f32 %v809_v2, %v747_v48  ;;  %v765_v36 = vmul.f32 %v1767_v57, %v1767_v57 }
 0x151   :  { %v679_v37 = vadd.f32 %v678_v40, %v1671_v56  ;;  %v811_v47 = vadd.f32 %v810_v6, %v748_v33  ;;  %v751_v56 = vmul.f32 %v1718_v20, %v1718_v20  ;;  %v766_v40 = vmul.f32 %v1804_v35, %v1804_v35 }
 0x153   :  { %v812_v13 = vadd.f32 %v811_v47, %v749_v41  ;;  %v680_v54 = vadd.f32 %v679_v37, %v1712_v18  ;;  %v753_v18 = vmul.f32 %v1764_v24, %v1764_v24  ;;  %v768_v41 = vmul.f32 %v1839_v8, %v1839_v8 }
 0x155   :  { %v813_v38 = vadd.f32 %v812_v13, %v750_v51  ;;  %v681_v53 = vadd.f32 %v680_v54, %v1718_v20  ;;  %v755_v20 = vmul.f32 %v1528_v49, %v1528_v49 }
 0x157   :  { %v814_v55 = vadd.f32 %v813_v38, %v751_v56  ;;  %v682_v19 = vadd.f32 %v681_v53, %v1758_v34  ;;  %v756_v34 = vmul.f32 %v1566_v4, %v1566_v4 }
 0x159   :  { %v815_v32 = vadd.f32 %v814_v55, %v752_v59  ;;  %v683_v61 = vadd.f32 %v682_v19, %v1764_v24  ;;  %v757_v24 = vmul.f32 %v1572_v10, %v1572_v10 }
 0x15b   :  { %v684_v3 = vadd.f32 %v683_v61, %v1522_v44  ;;  %v816_v9 = vadd.f32 %v815_v32, %v753_v18  ;;  %v758_v44 = vmul.f32 %v1609_v39, %v1609_v39 }
 0x15d   :  { %v685_v21 = vadd.f32 %v684_v3, %v1528_v49  ;;  %v817_v11 = vadd.f32 %v816_v9, %v754_v62  ;;  %v759_v49 = vmul.f32 %v1617_v50, %v1617_v50 }
 0x15f   :  { %v686_v63 = vadd.f32 %v685_v21, %v1566_v4  ;;  %v818_v25 = vadd.f32 %v817_v11, %v755_v20  ;;  %v760_v4 = vmul.f32 %v1667_v58, %v1667_v58 }
 0x161   :  { %v687_v1 = vadd.f32 %v686_v63, %v1572_v10  ;;  %v819_v52 = vadd.f32 %v818_v25, %v756_v34  ;;  %v761_v10 = vmul.f32 %v1674_v17, %v1674_v17 }
 0x163   :  { %v688_v16 = vadd.f32 %v687_v1, %v1609_v39  ;;  %v820_v60 = vadd.f32 %v819_v52, %v757_v24  ;;  %v762_v39 = vmul.f32 %v1715_v42, %v1715_v42 }
 0x165   :  { %v821_v27 = vadd.f32 %v820_v60, %v758_v44  ;;  %v689_v15 = vadd.f32 %v688_v16, %v1617_v50  ;;  %v763_v50 = vmul.f32 %v1721_v46, %v1721_v46 }
 0x167   :  { %v690_v26 = vadd.f32 %v689_v15, %v1667_v58  ;;  %v822_v22 = vadd.f32 %v821_v27, %v759_v49  ;;  %v764_v58 = vmul.f32 %v1761_v5, %v1761_v5 }
 0x169   :  { %v691_v28 = vadd.f32 %v690_v26, %v1674_v17  ;;  %v823_v43 = vadd.f32 %v822_v22, %v760_v4 }
 0x16b   :  { %v692_v30 = vadd.f32 %v691_v28, %v1715_v42  ;;  %v824_v31 = vadd.f32 %v823_v43, %v761_v10 }
 0x16d   :  { %v693_v7 = vadd.f32 %v692_v30, %v1721_v46  ;;  %v825_v0 = vadd.f32 %v824_v31, %v762_v39 }
 0x16f   :  { %v694_v23 = vadd.f32 %v693_v7, %v1761_v5  ;;  %v826_v48 = vadd.f32 %v825_v0, %v763_v50 }
 0x171   :  { %v695_v17 = vadd.f32 %v694_v23, %v1767_v57  ;;  %v827_v2 = vadd.f32 %v826_v48, %v764_v58 }
 0x173   :  { %v828_v42 = vadd.f32 %v827_v2, %v765_v36  ;;  %v696_v33 = vadd.f32 %v695_v17, %v1804_v35 }
 0x175   :  { %v829_v46 = vadd.f32 %v828_v42, %v766_v40  ;;  %v697_v6 = vadd.f32 %v696_v33, %v1807_v29 }
 0x177   :  { %v830_v5 = vadd.f32 %v829_v46, %v767_v12  ;;  %v698_v37 = vadd.f32 %v697_v6, %v1839_v8 }
 0x179   :  { %v831_v57 = vadd.f32 %v830_v5, %v768_v41  ;;  %v699_v47 = vadd.f32 %v698_v37, %v1842_v14 }
 0x17b   :  { %v700_v13 = vrot.slane %v699_v47, 4  ;;  %v832_v35 = vadd.f32 %v831_v57, %v769_v45 }
 0x17d   :  { %v701_v54 = vadd.f32 %v700_v13, %v699_v47  ;;  %v833_v51 = vrot.slane %v832_v35, 4 }
 0x17f   :  { %v702_v38 = vrot.slane %v701_v54, 2  ;;  %v834_v53 = vadd.f32 %v833_v51, %v832_v35 }
 0x181   :  { %v703_v56 = vadd.f32 %v702_v38, %v701_v54  ;;  %v835_v29 = vrot.slane %v834_v53, 2 }
 0x183   :  { %v704_v55 = vrot.slane %v703_v56, 1  ;;  %v836_v19 = vadd.f32 %v835_v29, %v834_v53 }
 0x185   :  { %v837_v59 = vrot.slane %v836_v19, 1  ;;  %v705_v32 = vadd.f32 %v704_v55, %v703_v56 }
 0x187   :  { %v838_v8 = vadd.f32 %v837_v59, %v836_v19 }
 0x189   :  { %v840_v61 = vsel %vm839_vm0, %v705_v32, %v838_v8 }
 0x18a   :  { %841 = vst [vmem:[%s1919_s4] sm:$0x3] %v840_v61 }

// kernel: decoder_forward.7
= control target key start
LH: loop header
LB: loop body
LE: loop exit
PB: predicated region body
PF: predicated region fallthrough
CT: control target
= control target key end

     0   :  { %s1017_s0 = inlined_call_operand.vmem [shape: bf16[512,128], index: 0, kind: input, shape index: {}]   ;;  %s1018_s1 = inlined_call_operand.vmem [shape: f32[1,128], index: 1, kind: input, shape index: {}]   ;;  %s1019_s2 = inlined_call_operand.vmem [shape: f32[1,128], index: 2, kind: input, shape index: {}]   ;;  %s1020_s3 = inlined_call_operand.vmem [shape: f32[512,128], index: 3, kind: output, shape index: {}]  }
   0x1   :  { %v411_v0 = vld [vmem:[%s1017_s0] sm:$0xff]   ;;  %v538_v5 = vld [vmem:[%s1017_s0 + $0x8] sm:$0xff]   ;;  %v539_v8 = vld [vmem:[%s1017_s0 + $0x10] sm:$0xff]  }
   0x2   :  { %v597_v1 = vld [vmem:[%s1018_s1] ss:$0 sm:$0xff]  ;;  %v412_v2 = vunpack.c.l.bf16 %v411_v0  ;;  %v413_v4 = vunpack.c.h.bf16 %v411_v0  ;;  %v416_v6 = vunpack.c.l.bf16 %v538_v5  ;;  %v417_v7 = vunpack.c.h.bf16 %v538_v5  ;;  %v540_v9 = vld [vmem:[%s1017_s0 + $0x18] sm:$0xff]   ;;  %v542_v31 = vld [vmem:[%s1017_s0 + $0x28] sm:$0xff]  }
   0x3   :  { %v602_v3 = vld [vmem:[%s1019_s2] ss:$0 sm:$0xff]  ;;  %v420_v12 = vunpack.c.l.bf16 %v539_v8  ;;  %v421_v13 = vunpack.c.h.bf16 %v539_v8  ;;  %v424_v16 = vunpack.c.l.bf16 %v540_v9  ;;  %v425_v17 = vunpack.c.h.bf16 %v540_v9  ;;  %v543_v36 = vld [vmem:[%s1017_s0 + $0x30] sm:$0xff]   ;;  %v544_v41 = vld [vmem:[%s1017_s0 + $0x38] sm:$0xff]  }
   0x4   :  { %v146_v10 = vmul.f32 %v597_v1, %v412_v2  ;;  %v147_v11 = vmul.f32 %v597_v1, %v413_v4  ;;  %v148_v14 = vmul.f32 %v597_v1, %v416_v6  ;;  %v149_v15 = vmul.f32 %v597_v1, %v417_v7  ;;  %v541_v26 = vld [vmem:[%s1017_s0 + $0x20] sm:$0xff]   ;;  %v546_v5 = vld [vmem:[%s1017_s0 + $0x48] sm:$0xff]  }
   0x5   :  { %v150_v20 = vmul.f32 %v597_v1, %v420_v12  ;;  %v151_v21 = vmul.f32 %v597_v1, %v421_v13  ;;  %v152_v24 = vmul.f32 %v597_v1, %v424_v16  ;;  %v153_v25 = vmul.f32 %v597_v1, %v425_v17  ;;  %v545_v62 = vld [vmem:[%s1017_s0 + $0x40] sm:$0xff]  }
   0x6   :  { %v214_v18 = vadd.f32 %v602_v3, %v146_v10  ;;  %v215_v19 = vadd.f32 %v602_v3, %v147_v11  ;;  %v216_v22 = vadd.f32 %v602_v3, %v148_v14  ;;  %v217_v23 = vadd.f32 %v602_v3, %v149_v15  ;;  %v547_v10 = vld [vmem:[%s1017_s0 + $0x50] sm:$0xff]   ;;  %v548_v15 = vld [vmem:[%s1017_s0 + $0x58] sm:$0xff]  }
   0x7   :  { %v218_v29 = vadd.f32 %v602_v3, %v150_v20  ;;  %v219_v30 = vadd.f32 %v602_v3, %v151_v21  ;;  %v220_v34 = vadd.f32 %v602_v3, %v152_v24  ;;  %v221_v35 = vadd.f32 %v602_v3, %v153_v25 }
   0x8   :  { %v278_v27 = vmax.f32 %v214_v18, 0.0  ;;  %v279_v28 = vmax.f32 %v215_v19, 0.0  ;;  %v280_v32 = vmax.f32 %v216_v22, 0.0  ;;  %v281_v33 = vmax.f32 %v217_v23, 0.0 }
   0x9   :  { %v282_v37 = vmax.f32 %v218_v29, 0.0  ;;  %v283_v38 = vmax.f32 %v219_v30, 0.0  ;;  %v428_v39 = vunpack.c.l.bf16 %v541_v26  ;;  %v429_v40 = vunpack.c.h.bf16 %v541_v26 }
   0xa   :  { %342 = vst [vmem:[%s1020_s3] sm:$0xff] %v278_v27  ;;  %v284_v42 = vmax.f32 %v220_v34, 0.0  ;;  %v285_v43 = vmax.f32 %v221_v35, 0.0  ;;  %v432_v44 = vunpack.c.l.bf16 %v542_v31  ;;  %v433_v45 = vunpack.c.h.bf16 %v542_v31 }
   0xb   :  { %343 = vst [vmem:[%s1020_s3 + $0x8] sm:$0xff] %v279_v28  ;;  %v154_v46 = vmul.f32 %v597_v1, %v428_v39  ;;  %v155_v47 = vmul.f32 %v597_v1, %v429_v40  ;;  %v436_v48 = vunpack.c.l.bf16 %v543_v36  ;;  %v437_v49 = vunpack.c.h.bf16 %v543_v36  ;;  %v549_v36 = vld [vmem:[%s1017_s0 + $0x60] sm:$0xff]  }
   0xc   :  { %344 = vst [vmem:[%s1020_s3 + $0x10] sm:$0xff] %v280_v32  ;;  %v156_v50 = vmul.f32 %v597_v1, %v432_v44  ;;  %v157_v51 = vmul.f32 %v597_v1, %v433_v45  ;;  %v440_v52 = vunpack.c.l.bf16 %v544_v41  ;;  %v441_v53 = vunpack.c.h.bf16 %v544_v41  ;;  %v550_v41 = vld [vmem:[%s1017_s0 + $0x68] sm:$0xff]  }
   0xd   :  { %345 = vst [vmem:[%s1020_s3 + $0x18] sm:$0xff] %v281_v33  ;;  %v222_v54 = vadd.f32 %v602_v3, %v154_v46  ;;  %v223_v55 = vadd.f32 %v602_v3, %v155_v47  ;;  %v158_v56 = vmul.f32 %v597_v1, %v436_v48  ;;  %v159_v57 = vmul.f32 %v597_v1, %v437_v49  ;;  %v551_v46 = vld [vmem:[%s1017_s0 + $0x70] sm:$0xff]  }
   0xe   :  { %346 = vst [vmem:[%s1020_s3 + $0x20] sm:$0xff] %v282_v37  ;;  %v224_v58 = vadd.f32 %v602_v3, %v156_v50  ;;  %v225_v59 = vadd.f32 %v602_v3, %v157_v51  ;;  %v160_v60 = vmul.f32 %v597_v1, %v440_v52  ;;  %v161_v61 = vmul.f32 %v597_v1, %v441_v53  ;;  %v552_v51 = vld [vmem:[%s1017_s0 + $0x78] sm:$0xff]  }
   0xf   :  { %347 = vst [vmem:[%s1020_s3 + $0x28] sm:$0xff] %v283_v38  ;;  %v286_v63 = vmax.f32 %v222_v54, 0.0  ;;  %v287_v0 = vmax.f32 %v223_v55, 0.0  ;;  %v226_v2 = vadd.f32 %v602_v3, %v158_v56  ;;  %v227_v4 = vadd.f32 %v602_v3, %v159_v57 }
  0x10   :  { %348 = vst [vmem:[%s1020_s3 + $0x30] sm:$0xff] %v284_v42  ;;  %v288_v6 = vmax.f32 %v224_v58, 0.0  ;;  %v289_v7 = vmax.f32 %v225_v59, 0.0  ;;  %v228_v8 = vadd.f32 %v602_v3, %v160_v60  ;;  %v229_v9 = vadd.f32 %v602_v3, %v161_v61 }
  0x11   :  { %349 = vst [vmem:[%s1020_s3 + $0x38] sm:$0xff] %v285_v43  ;;  %v290_v11 = vmax.f32 %v226_v2, 0.0  ;;  %v291_v12 = vmax.f32 %v227_v4, 0.0  ;;  %v444_v13 = vunpack.c.l.bf16 %v545_v62  ;;  %v445_v14 = vunpack.c.h.bf16 %v545_v62 }
  0x12   :  { %350 = vst [vmem:[%s1020_s3 + $0x40] sm:$0xff] %v286_v63  ;;  %v292_v16 = vmax.f32 %v228_v8, 0.0  ;;  %v293_v17 = vmax.f32 %v229_v9, 0.0  ;;  %v448_v18 = vunpack.c.l.bf16 %v546_v5  ;;  %v449_v19 = vunpack.c.h.bf16 %v546_v5 }
  0x13   :  { %351 = vst [vmem:[%s1020_s3 + $0x48] sm:$0xff] %v287_v0  ;;  %v162_v20 = vmul.f32 %v597_v1, %v444_v13  ;;  %v163_v21 = vmul.f32 %v597_v1, %v445_v14  ;;  %v452_v22 = vunpack.c.l.bf16 %v547_v10  ;;  %v453_v23 = vunpack.c.h.bf16 %v547_v10  ;;  %v553_v10 = vld [vmem:[%s1017_s0 + $0x80] sm:$0xff]  }
  0x14   :  { %352 = vst [vmem:[%s1020_s3 + $0x50] sm:$0xff] %v288_v6  ;;  %v164_v24 = vmul.f32 %v597_v1, %v448_v18  ;;  %v165_v25 = vmul.f32 %v597_v1, %v449_v19  ;;  %v456_v26 = vunpack.c.l.bf16 %v548_v15  ;;  %v457_v27 = vunpack.c.h.bf16 %v548_v15  ;;  %v554_v15 = vld [vmem:[%s1017_s0 + $0x88] sm:$0xff]  }
  0x15   :  { %353 = vst [vmem:[%s1020_s3 + $0x58] sm:$0xff] %v289_v7  ;;  %v230_v28 = vadd.f32 %v602_v3, %v162_v20  ;;  %v231_v29 = vadd.f32 %v602_v3, %v163_v21  ;;  %v166_v30 = vmul.f32 %v597_v1, %v452_v22  ;;  %v167_v31 = vmul.f32 %v597_v1, %v453_v23  ;;  %v555_v20 = vld [vmem:[%s1017_s0 + $0x90] sm:$0xff]  }
  0x16   :  { %354 = vst [vmem:[%s1020_s3 + $0x60] sm:$0xff] %v290_v11  ;;  %v232_v32 = vadd.f32 %v602_v3, %v164_v24  ;;  %v233_v33 = vadd.f32 %v602_v3, %v165_v25  ;;  %v168_v34 = vmul.f32 %v597_v1, %v456_v26  ;;  %v169_v35 = vmul.f32 %v597_v1, %v457_v27  ;;  %v556_v25 = vld [vmem:[%s1017_s0 + $0x98] sm:$0xff]  }
  0x17   :  { %355 = vst [vmem:[%s1020_s3 + $0x68] sm:$0xff] %v291_v12  ;;  %v294_v37 = vmax.f32 %v230_v28, 0.0  ;;  %v295_v38 = vmax.f32 %v231_v29, 0.0  ;;  %v234_v39 = vadd.f32 %v602_v3, %v166_v30  ;;  %v235_v40 = vadd.f32 %v602_v3, %v167_v31 }
  0x18   :  { %356 = vst [vmem:[%s1020_s3 + $0x70] sm:$0xff] %v292_v16  ;;  %v296_v42 = vmax.f32 %v232_v32, 0.0  ;;  %v297_v43 = vmax.f32 %v233_v33, 0.0  ;;  %v236_v44 = vadd.f32 %v602_v3, %v168_v34  ;;  %v237_v45 = vadd.f32 %v602_v3, %v169_v35 }
  0x19   :  { %357 = vst [vmem:[%s1020_s3 + $0x78] sm:$0xff] %v293_v17  ;;  %v298_v47 = vmax.f32 %v234_v39, 0.0  ;;  %v299_v48 = vmax.f32 %v235_v40, 0.0  ;;  %v460_v49 = vunpack.c.l.bf16 %v549_v36  ;;  %v461_v50 = vunpack.c.h.bf16 %v549_v36 }
  0x1a   :  { %358 = vst [vmem:[%s1020_s3 + $0x80] sm:$0xff] %v294_v37  ;;  %v300_v52 = vmax.f32 %v236_v44, 0.0  ;;  %v301_v53 = vmax.f32 %v237_v45, 0.0  ;;  %v464_v54 = vunpack.c.l.bf16 %v550_v41  ;;  %v465_v55 = vunpack.c.h.bf16 %v550_v41 }
  0x1b   :  { %359 = vst [vmem:[%s1020_s3 + $0x88] sm:$0xff] %v295_v38  ;;  %v170_v56 = vmul.f32 %v597_v1, %v460_v49  ;;  %v171_v57 = vmul.f32 %v597_v1, %v461_v50  ;;  %v468_v58 = vunpack.c.l.bf16 %v551_v46  ;;  %v469_v59 = vunpack.c.h.bf16 %v551_v46  ;;  %v557_v46 = vld [vmem:[%s1017_s0 + $0xa0] sm:$0xff]  }
  0x1c   :  { %360 = vst [vmem:[%s1020_s3 + $0x90] sm:$0xff] %v296_v42  ;;  %v172_v60 = vmul.f32 %v597_v1, %v464_v54  ;;  %v173_v61 = vmul.f32 %v597_v1, %v465_v55  ;;  %v472_v62 = vunpack.c.l.bf16 %v552_v51  ;;  %v473_v63 = vunpack.c.h.bf16 %v552_v51  ;;  %v558_v51 = vld [vmem:[%s1017_s0 + $0xa8] sm:$0xff]  }
  0x1d   :  { %361 = vst [vmem:[%s1020_s3 + $0x98] sm:$0xff] %v297_v43  ;;  %v238_v0 = vadd.f32 %v602_v3, %v170_v56  ;;  %v239_v2 = vadd.f32 %v602_v3, %v171_v57  ;;  %v174_v4 = vmul.f32 %v597_v1, %v468_v58  ;;  %v175_v5 = vmul.f32 %v597_v1, %v469_v59  ;;  %v559_v56 = vld [vmem:[%s1017_s0 + $0xb0] sm:$0xff]  }
  0x1e   :  { %362 = vst [vmem:[%s1020_s3 + $0xa0] sm:$0xff] %v298_v47  ;;  %v240_v6 = vadd.f32 %v602_v3, %v172_v60  ;;  %v241_v7 = vadd.f32 %v602_v3, %v173_v61  ;;  %v176_v8 = vmul.f32 %v597_v1, %v472_v62  ;;  %v177_v9 = vmul.f32 %v597_v1, %v473_v63  ;;  %v560_v61 = vld [vmem:[%s1017_s0 + $0xb8] sm:$0xff]  }
  0x1f   :  { %363 = vst [vmem:[%s1020_s3 + $0xa8] sm:$0xff] %v299_v48  ;;  %v302_v11 = vmax.f32 %v238_v0, 0.0  ;;  %v303_v12 = vmax.f32 %v239_v2, 0.0  ;;  %v242_v13 = vadd.f32 %v602_v3, %v174_v4  ;;  %v243_v14 = vadd.f32 %v602_v3, %v175_v5 }
  0x20   :  { %364 = vst [vmem:[%s1020_s3 + $0xb0] sm:$0xff] %v300_v52  ;;  %v304_v16 = vmax.f32 %v240_v6, 0.0  ;;  %v305_v17 = vmax.f32 %v241_v7, 0.0  ;;  %v244_v18 = vadd.f32 %v602_v3, %v176_v8  ;;  %v245_v19 = vadd.f32 %v602_v3, %v177_v9 }
  0x21   :  { %365 = vst [vmem:[%s1020_s3 + $0xb8] sm:$0xff] %v301_v53  ;;  %v306_v21 = vmax.f32 %v242_v13, 0.0  ;;  %v307_v22 = vmax.f32 %v243_v14, 0.0  ;;  %v476_v23 = vunpack.c.l.bf16 %v553_v10  ;;  %v477_v24 = vunpack.c.h.bf16 %v553_v10 }
  0x22   :  { %366 = vst [vmem:[%s1020_s3 + $0xc0] sm:$0xff] %v302_v11  ;;  %v308_v26 = vmax.f32 %v244_v18, 0.0  ;;  %v309_v27 = vmax.f32 %v245_v19, 0.0  ;;  %v480_v28 = vunpack.c.l.bf16 %v554_v15  ;;  %v481_v29 = vunpack.c.h.bf16 %v554_v15 }
  0x23   :  { %367 = vst [vmem:[%s1020_s3 + $0xc8] sm:$0xff] %v303_v12  ;;  %v178_v30 = vmul.f32 %v597_v1, %v476_v23  ;;  %v179_v31 = vmul.f32 %v597_v1, %v477_v24  ;;  %v484_v32 = vunpack.c.l.bf16 %v555_v20  ;;  %v485_v33 = vunpack.c.h.bf16 %v555_v20  ;;  %v561_v20 = vld [vmem:[%s1017_s0 + $0xc0] sm:$0xff]  }
  0x24   :  { %368 = vst [vmem:[%s1020_s3 + $0xd0] sm:$0xff] %v304_v16  ;;  %v180_v34 = vmul.f32 %v597_v1, %v480_v28  ;;  %v181_v35 = vmul.f32 %v597_v1, %v481_v29  ;;  %v488_v36 = vunpack.c.l.bf16 %v556_v25  ;;  %v489_v37 = vunpack.c.h.bf16 %v556_v25  ;;  %v562_v25 = vld [vmem:[%s1017_s0 + $0xc8] sm:$0xff]  }
  0x25   :  { %369 = vst [vmem:[%s1020_s3 + $0xd8] sm:$0xff] %v305_v17  ;;  %v246_v38 = vadd.f32 %v602_v3, %v178_v30  ;;  %v247_v39 = vadd.f32 %v602_v3, %v179_v31  ;;  %v182_v40 = vmul.f32 %v597_v1, %v484_v32  ;;  %v183_v41 = vmul.f32 %v597_v1, %v485_v33  ;;  %v563_v30 = vld [vmem:[%s1017_s0 + $0xd0] sm:$0xff]  }
  0x26   :  { %370 = vst [vmem:[%s1020_s3 + $0xe0] sm:$0xff] %v306_v21  ;;  %v248_v42 = vadd.f32 %v602_v3, %v180_v34  ;;  %v249_v43 = vadd.f32 %v602_v3, %v181_v35  ;;  %v184_v44 = vmul.f32 %v597_v1, %v488_v36  ;;  %v185_v45 = vmul.f32 %v597_v1, %v489_v37  ;;  %v564_v35 = vld [vmem:[%s1017_s0 + $0xd8] sm:$0xff]  }
  0x27   :  { %371 = vst [vmem:[%s1020_s3 + $0xe8] sm:$0xff] %v307_v22  ;;  %v310_v47 = vmax.f32 %v246_v38, 0.0  ;;  %v311_v48 = vmax.f32 %v247_v39, 0.0  ;;  %v250_v49 = vadd.f32 %v602_v3, %v182_v40  ;;  %v251_v50 = vadd.f32 %v602_v3, %v183_v41 }
  0x28   :  { %372 = vst [vmem:[%s1020_s3 + $0xf0] sm:$0xff] %v308_v26  ;;  %v312_v52 = vmax.f32 %v248_v42, 0.0  ;;  %v313_v53 = vmax.f32 %v249_v43, 0.0  ;;  %v252_v54 = vadd.f32 %v602_v3, %v184_v44  ;;  %v253_v55 = vadd.f32 %v602_v3, %v185_v45 }
  0x29   :  { %373 = vst [vmem:[%s1020_s3 + $0xf8] sm:$0xff] %v309_v27  ;;  %v314_v57 = vmax.f32 %v250_v49, 0.0  ;;  %v315_v58 = vmax.f32 %v251_v50, 0.0  ;;  %v492_v59 = vunpack.c.l.bf16 %v557_v46  ;;  %v493_v60 = vunpack.c.h.bf16 %v557_v46 }
  0x2a   :  { %374 = vst [vmem:[%s1020_s3 + $0x100] sm:$0xff] %v310_v47  ;;  %v316_v62 = vmax.f32 %v252_v54, 0.0  ;;  %v317_v63 = vmax.f32 %v253_v55, 0.0  ;;  %v496_v0 = vunpack.c.l.bf16 %v558_v51  ;;  %v497_v2 = vunpack.c.h.bf16 %v558_v51 }
  0x2b   :  { %375 = vst [vmem:[%s1020_s3 + $0x108] sm:$0xff] %v311_v48  ;;  %v186_v4 = vmul.f32 %v597_v1, %v492_v59  ;;  %v187_v5 = vmul.f32 %v597_v1, %v493_v60  ;;  %v500_v6 = vunpack.c.l.bf16 %v559_v56  ;;  %v501_v7 = vunpack.c.h.bf16 %v559_v56  ;;  %v565_v56 = vld [vmem:[%s1017_s0 + $0xe0] sm:$0xff]  }
  0x2c   :  { %376 = vst [vmem:[%s1020_s3 + $0x110] sm:$0xff] %v312_v52  ;;  %v188_v8 = vmul.f32 %v597_v1, %v496_v0  ;;  %v189_v9 = vmul.f32 %v597_v1, %v497_v2  ;;  %v504_v10 = vunpack.c.l.bf16 %v560_v61  ;;  %v505_v11 = vunpack.c.h.bf16 %v560_v61  ;;  %v566_v61 = vld [vmem:[%s1017_s0 + $0xe8] sm:$0xff]  }
  0x2d   :  { %377 = vst [vmem:[%s1020_s3 + $0x118] sm:$0xff] %v313_v53  ;;  %v254_v12 = vadd.f32 %v602_v3, %v186_v4  ;;  %v255_v13 = vadd.f32 %v602_v3, %v187_v5  ;;  %v190_v14 = vmul.f32 %v597_v1, %v500_v6  ;;  %v191_v15 = vmul.f32 %v597_v1, %v501_v7  ;;  %v567_v4 = vld [vmem:[%s1017_s0 + $0xf0] sm:$0xff]  }
  0x2e   :  { %378 = vst [vmem:[%s1020_s3 + $0x120] sm:$0xff] %v314_v57  ;;  %v256_v16 = vadd.f32 %v602_v3, %v188_v8  ;;  %v257_v17 = vadd.f32 %v602_v3, %v189_v9  ;;  %v192_v18 = vmul.f32 %v597_v1, %v504_v10  ;;  %v193_v19 = vmul.f32 %v597_v1, %v505_v11  ;;  %v568_v9 = vld [vmem:[%s1017_s0 + $0xf8] sm:$0xff]  }
  0x2f   :  { %379 = vst [vmem:[%s1020_s3 + $0x128] sm:$0xff] %v315_v58  ;;  %v318_v21 = vmax.f32 %v254_v12, 0.0  ;;  %v319_v22 = vmax.f32 %v255_v13, 0.0  ;;  %v258_v23 = vadd.f32 %v602_v3, %v190_v14  ;;  %v259_v24 = vadd.f32 %v602_v3, %v191_v15 }
  0x30   :  { %380 = vst [vmem:[%s1020_s3 + $0x130] sm:$0xff] %v316_v62  ;;  %v320_v26 = vmax.f32 %v256_v16, 0.0  ;;  %v321_v27 = vmax.f32 %v257_v17, 0.0  ;;  %v260_v28 = vadd.f32 %v602_v3, %v192_v18  ;;  %v261_v29 = vadd.f32 %v602_v3, %v193_v19 }
  0x31   :  { %381 = vst [vmem:[%s1020_s3 + $0x138] sm:$0xff] %v317_v63  ;;  %v322_v31 = vmax.f32 %v258_v23, 0.0  ;;  %v323_v32 = vmax.f32 %v259_v24, 0.0  ;;  %v508_v33 = vunpack.c.l.bf16 %v561_v20  ;;  %v509_v34 = vunpack.c.h.bf16 %v561_v20 }
  0x32   :  { %382 = vst [vmem:[%s1020_s3 + $0x140] sm:$0xff] %v318_v21  ;;  %v324_v36 = vmax.f32 %v260_v28, 0.0  ;;  %v325_v37 = vmax.f32 %v261_v29, 0.0  ;;  %v512_v38 = vunpack.c.l.bf16 %v562_v25  ;;  %v513_v39 = vunpack.c.h.bf16 %v562_v25 }
  0x33   :  { %383 = vst [vmem:[%s1020_s3 + $0x148] sm:$0xff] %v319_v22  ;;  %v194_v40 = vmul.f32 %v597_v1, %v508_v33  ;;  %v195_v41 = vmul.f32 %v597_v1, %v509_v34  ;;  %v516_v42 = vunpack.c.l.bf16 %v563_v30  ;;  %v517_v43 = vunpack.c.h.bf16 %v563_v30 }
  0x34   :  { %384 = vst [vmem:[%s1020_s3 + $0x150] sm:$0xff] %v320_v26  ;;  %v196_v44 = vmul.f32 %v597_v1, %v512_v38  ;;  %v197_v45 = vmul.f32 %v597_v1, %v513_v39  ;;  %v520_v46 = vunpack.c.l.bf16 %v564_v35  ;;  %v521_v47 = vunpack.c.h.bf16 %v564_v35 }
  0x35   :  { %385 = vst [vmem:[%s1020_s3 + $0x158] sm:$0xff] %v321_v27  ;;  %v262_v48 = vadd.f32 %v602_v3, %v194_v40  ;;  %v263_v49 = vadd.f32 %v602_v3, %v195_v41  ;;  %v198_v50 = vmul.f32 %v597_v1, %v516_v42  ;;  %v199_v51 = vmul.f32 %v597_v1, %v517_v43 }
  0x36   :  { %386 = vst [vmem:[%s1020_s3 + $0x160] sm:$0xff] %v322_v31  ;;  %v264_v52 = vadd.f32 %v602_v3, %v196_v44  ;;  %v265_v53 = vadd.f32 %v602_v3, %v197_v45  ;;  %v200_v54 = vmul.f32 %v597_v1, %v520_v46  ;;  %v201_v55 = vmul.f32 %v597_v1, %v521_v47 }
  0x37   :  { %387 = vst [vmem:[%s1020_s3 + $0x168] sm:$0xff] %v323_v32  ;;  %v326_v57 = vmax.f32 %v262_v48, 0.0  ;;  %v327_v58 = vmax.f32 %v263_v49, 0.0  ;;  %v266_v59 = vadd.f32 %v602_v3, %v198_v50  ;;  %v267_v60 = vadd.f32 %v602_v3, %v199_v51 }
  0x38   :  { %388 = vst [vmem:[%s1020_s3 + $0x170] sm:$0xff] %v324_v36  ;;  %v328_v62 = vmax.f32 %v264_v52, 0.0  ;;  %v329_v63 = vmax.f32 %v265_v53, 0.0  ;;  %v268_v0 = vadd.f32 %v602_v3, %v200_v54  ;;  %v269_v2 = vadd.f32 %v602_v3, %v201_v55 }
  0x39   :  { %389 = vst [vmem:[%s1020_s3 + $0x178] sm:$0xff] %v325_v37  ;;  %v330_v5 = vmax.f32 %v266_v59, 0.0  ;;  %v331_v6 = vmax.f32 %v267_v60, 0.0  ;;  %v524_v7 = vunpack.c.l.bf16 %v565_v56  ;;  %v525_v8 = vunpack.c.h.bf16 %v565_v56 }
  0x3a   :  { %390 = vst [vmem:[%s1020_s3 + $0x180] sm:$0xff] %v326_v57  ;;  %v332_v10 = vmax.f32 %v268_v0, 0.0  ;;  %v333_v11 = vmax.f32 %v269_v2, 0.0  ;;  %v528_v12 = vunpack.c.l.bf16 %v566_v61  ;;  %v529_v13 = vunpack.c.h.bf16 %v566_v61 }
  0x3b   :  { %391 = vst [vmem:[%s1020_s3 + $0x188] sm:$0xff] %v327_v58  ;;  %v202_v14 = vmul.f32 %v597_v1, %v524_v7  ;;  %v203_v15 = vmul.f32 %v597_v1, %v525_v8  ;;  %v532_v16 = vunpack.c.l.bf16 %v567_v4  ;;  %v533_v17 = vunpack.c.h.bf16 %v567_v4 }
  0x3c   :  { %392 = vst [vmem:[%s1020_s3 + $0x190] sm:$0xff] %v328_v62  ;;  %v204_v18 = vmul.f32 %v597_v1, %v528_v12  ;;  %v205_v19 = vmul.f32 %v597_v1, %v529_v13  ;;  %v536_v20 = vunpack.c.l.bf16 %v568_v9  ;;  %v537_v21 = vunpack.c.h.bf16 %v568_v9 }
  0x3d   :  { %393 = vst [vmem:[%s1020_s3 + $0x198] sm:$0xff] %v329_v63  ;;  %v270_v22 = vadd.f32 %v602_v3, %v202_v14  ;;  %v271_v23 = vadd.f32 %v602_v3, %v203_v15  ;;  %v206_v24 = vmul.f32 %v597_v1, %v532_v16  ;;  %v207_v25 = vmul.f32 %v597_v1, %v533_v17 }
  0x3e   :  { %394 = vst [vmem:[%s1020_s3 + $0x1a0] sm:$0xff] %v330_v5  ;;  %v272_v26 = vadd.f32 %v602_v3, %v204_v18  ;;  %v273_v27 = vadd.f32 %v602_v3, %v205_v19  ;;  %v208_v28 = vmul.f32 %v597_v1, %v536_v20  ;;  %v209_v29 = vmul.f32 %v597_v1, %v537_v21 }
  0x3f   :  { %395 = vst [vmem:[%s1020_s3 + $0x1a8] sm:$0xff] %v331_v6  ;;  %v334_v30 = vmax.f32 %v270_v22, 0.0  ;;  %v335_v31 = vmax.f32 %v271_v23, 0.0  ;;  %v274_v32 = vadd.f32 %v602_v3, %v206_v24  ;;  %v275_v33 = vadd.f32 %v602_v3, %v207_v25 }
  0x40   :  { %396 = vst [vmem:[%s1020_s3 + $0x1b0] sm:$0xff] %v332_v10  ;;  %v336_v34 = vmax.f32 %v272_v26, 0.0  ;;  %v337_v35 = vmax.f32 %v273_v27, 0.0  ;;  %v276_v36 = vadd.f32 %v602_v3, %v208_v28  ;;  %v277_v1 = vadd.f32 %v602_v3, %v209_v29 }
  0x41   :  { %397 = vst [vmem:[%s1020_s3 + $0x1b8] sm:$0xff] %v333_v11  ;;  %v338_v37 = vmax.f32 %v274_v32, 0.0  ;;  %v339_v38 = vmax.f32 %v275_v33, 0.0 }
  0x42   :  { %398 = vst [vmem:[%s1020_s3 + $0x1c0] sm:$0xff] %v334_v30  ;;  %v340_v39 = vmax.f32 %v276_v36, 0.0  ;;  %v341_v3 = vmax.f32 %v277_v1, 0.0 }
  0x43   :  { %399 = vst [vmem:[%s1020_s3 + $0x1c8] sm:$0xff] %v335_v31 }
  0x44   :  { %400 = vst [vmem:[%s1020_s3 + $0x1d0] sm:$0xff] %v336_v34 }
  0x45   :  { %401 = vst [vmem:[%s1020_s3 + $0x1d8] sm:$0xff] %v337_v35 }
  0x46   :  { %402 = vst [vmem:[%s1020_s3 + $0x1e0] sm:$0xff] %v338_v37 }
  0x47   :  { %403 = vst [vmem:[%s1020_s3 + $0x1e8] sm:$0xff] %v339_v38 }
  0x48   :  { %404 = vst [vmem:[%s1020_s3 + $0x1f0] sm:$0xff] %v340_v39 }
  0x49   :  { %405 = vst [vmem:[%s1020_s3 + $0x1f8] sm:$0xff] %v341_v3 }

</bundles_post_ra>
